<compile_context>
chip_gen: v5e
topology: v5e:2x2
jax: 0.10.0
libtpu: 0.0.40
codegen_flags: <defaults>
</compile_context>

<pallas_src>
import functools

import jax
import jax.numpy as jnp
import numpy as np
from jax.experimental import pallas as pl
from jax.experimental.pallas import tpu as pltpu

NEG_SLOPE = 0.01      # nn.LeakyReLU default negative_slope
BN_EPS = 1e-5         # nn.BatchNorm2d default eps


# ---------------------------------------------------------------------------
# Fused Pallas kernel: MaxPool2d(2) -> (Conv3x3 + BN + LeakyReLU) x 2
# ---------------------------------------------------------------------------

def _encoder_fused_kernel(x_ref, w1_ref, s1_ref, b1_ref, w2_ref, s2_ref, b2_ref,
                          o_ref, xp1_ref, xp2_ref, *, ho, wo, cin, cout):
    """One image per grid step.

      x_ref  : (ho, 2, wo, 2*cin) bf16  pre-pool image, dim1 = vertical 2x2 pair,
                                        last dim packs (horizontal pair, cin)
      w1_ref : (9*cin, cout)      bf16  conv1 weight, K ordered (kh, kw, cin)
      w2_ref : (9*cout, cout)     bf16  conv2 weight
      s*_ref / b*_ref : (1, cout) f32   folded BatchNorm scale / bias
      o_ref  : (cout, ho*wo)      f32   lane-dense (spatial on lanes) == NCHW slab
      xp1_ref: (ho+2, wo+2, cin)  f32   VMEM scratch: padded pooled input
      xp2_ref: (ho+2, wo+2, cout) f32   VMEM scratch: padded conv1 activation
    """
    # ---------------- MaxPool2d(2) (in VMEM, no HBM corner copies) ----------------
    xv = x_ref[...].astype(jnp.float32)               # (ho, 2, wo, 2*cin)
    m = jnp.maximum(xv[:, 0], xv[:, 1])               # max over vertical pair
    pooled = jnp.maximum(m[:, :, :cin], m[:, :, cin:])  # max over horizontal pair
    # pooled: (ho, wo, cin) f32

    # ---------------- zero-pad(1) into VMEM scratch (no wrapper jnp.pad) ----------
    xp1_ref[...] = jnp.zeros_like(xp1_ref)
    for r in range(ho):
        xp1_ref[1 + r, 1:1 + wo, :] = pooled[r]

    def conv3x3_bn_lrelu(xp_ref, c_in, w_ref, s_ref, b_ref):
        # Deep-K im2col: build one (ho*wo, 9*c_in) slab from the VMEM-resident padded
        # input and run a single MXU matmul (bf16 operands, f32 accumulate).
        xp = xp_ref[...]                               # (ho+2, wo+2, c_in) f32
        cols = []
        for dy in range(3):
            for dx in range(3):
                patch = xp[dy:dy + ho, dx:dx + wo, :]  # (ho, wo, c_in)
                cols.append(patch.reshape(ho * wo, c_in))
        patches = jnp.concatenate(cols, axis=-1).astype(jnp.bfloat16)  # (ho*wo, 9*c_in)
        y = jnp.dot(patches, w_ref[...], preferred_element_type=jnp.float32)
        y = y * s_ref[...] + b_ref[...]                # folded BN (f32 epilogue)
        return jnp.where(y >= 0.0, y, NEG_SLOPE * y)   # LeakyReLU

    # ---------------- conv1 -> stash padded activation in VMEM --------------------
    y1 = conv3x3_bn_lrelu(xp1_ref, cin, w1_ref, s1_ref, b1_ref)   # (ho*wo, cout) f32
    xp2_ref[...] = jnp.zeros_like(xp2_ref)
    for r in range(ho):
        xp2_ref[1 + r, 1:1 + wo, :] = y1[r * wo:(r + 1) * wo, :]

    # ---------------- conv2 --------------------------------------------------------
    y2 = conv3x3_bn_lrelu(xp2_ref, cout, w2_ref, s2_ref, b2_ref)  # (ho*wo, cout) f32

    # ---------------- lane-dense NCHW store (lane dim = ho*wo) ---------------------
    o_ref[...] = y2.T                                  # (cout, ho*wo)


def encoder_forward(x_nchw, params):
    """Encoder.forward: MaxPool2d(2) -> Conv3x3-BN-LeakyReLU -> Conv3x3-BN-LeakyReLU."""
    N, Cin, H, W = x_nchw.shape
    Ho, Wo = H // 2, W // 2
    Cout = params["w1"].shape[-1]

    # NCHW -> NHWC + bf16 cast in one XLA pass over the (small) input; everything
    # after this is a free view — no corner copies, no pad copies.
    x = jnp.transpose(x_nchw, (0, 2, 3, 1)).astype(jnp.bfloat16)
    x = x[:, :2 * Ho, :2 * Wo, :].reshape(N, Ho, 2, Wo, 2 * Cin)

    # Conv weights flattened to deep-K matmul operands, K ordered (kh, kw, cin).
    w1 = params["w1"].astype(jnp.bfloat16).reshape(9 * Cin, Cout)
    w2 = params["w2"].astype(jnp.bfloat16).reshape(9 * Cout, Cout)
    s1 = params["s1"].astype(jnp.float32).reshape(1, Cout)
    b1 = params["b1"].astype(jnp.float32).reshape(1, Cout)
    s2 = params["s2"].astype(jnp.float32).reshape(1, Cout)
    b2 = params["b2"].astype(jnp.float32).reshape(1, Cout)

    out = pl.pallas_call(
        functools.partial(_encoder_fused_kernel, ho=Ho, wo=Wo, cin=Cin, cout=Cout),
        out_shape=jax.ShapeDtypeStruct((N, Cout, Ho * Wo), jnp.float32),
        grid=(N,),
        in_specs=[
            pl.BlockSpec((None, Ho, 2, Wo, 2 * Cin), lambda b: (b, 0, 0, 0, 0)),
            pl.BlockSpec((9 * Cin, Cout), lambda b: (0, 0)),
            pl.BlockSpec((1, Cout), lambda b: (0, 0)),
            pl.BlockSpec((1, Cout), lambda b: (0, 0)),
            pl.BlockSpec((9 * Cout, Cout), lambda b: (0, 0)),
            pl.BlockSpec((1, Cout), lambda b: (0, 0)),
            pl.BlockSpec((1, Cout), lambda b: (0, 0)),
        ],
        out_specs=pl.BlockSpec((None, Cout, Ho * Wo), lambda b: (b, 0, 0)),
        scratch_shapes=[
            pltpu.VMEM((Ho + 2, Wo + 2, Cin), jnp.float32),
            pltpu.VMEM((Ho + 2, Wo + 2, Cout), jnp.float32),
        ],
        compiler_params=pltpu.CompilerParams(dimension_semantics=("parallel",)),
    )(x, w1, s1, b1, w2, s2, b2)

    # (N, Cout, Ho*Wo) -> (N, Cout, Ho, Wo): free reshape, already NCHW.
    return out.reshape(N, Cout, Ho, Wo)


# ---------------------------------------------------------------------------
# Parameter init (deterministic, synthetic)
# ---------------------------------------------------------------------------

def _conv_init(key, kh, kw, cin, cout):
    fan_in = kh * kw * cin
    bound = 1.0 / np.sqrt(fan_in)
    return jax.random.uniform(key, (kh, kw, cin, cout), jnp.float32, -bound, bound)


def _bn_fold_init(key, c):
    """Random eval-mode BN params folded into a per-channel scale/bias."""
    k1, k2, k3, k4 = jax.random.split(key, 4)
    gamma = 1.0 + 0.1 * jax.random.normal(k1, (c,), jnp.float32)
    beta = 0.1 * jax.random.normal(k2, (c,), jnp.float32)
    mean = 0.1 * jax.random.normal(k3, (c,), jnp.float32)
    var = 1.0 + 0.5 * jax.random.uniform(k4, (c,), jnp.float32)
    scale = gamma / jnp.sqrt(var + BN_EPS)
    bias = beta - mean * scale
    return scale, bias


def init_encoder_params(key, in_channels, out_channels):
    ks = jax.random.split(key, 4)
    p = {"w1": _conv_init(ks[0], 3, 3, in_channels, out_channels),
         "w2": _conv_init(ks[1], 3, 3, out_channels, out_channels)}
    p["s1"], p["b1"] = _bn_fold_init(ks[2], out_channels)
    p["s2"], p["b2"] = _bn_fold_init(ks[3], out_channels)
    return p


def _reference_forward(x_nchw, params):
    """Pure-JAX (XLA) reference for a tolerance check."""
    x = jnp.transpose(x_nchw, (0, 2, 3, 1)).astype(jnp.float32)
    N, H, W, C = x.shape
    Ho, Wo = H // 2, W // 2
    x = x[:, :2 * Ho, :2 * Wo, :].reshape(N, Ho, 2, Wo, 2, C).max(axis=(2, 4))

    def conv_bn_lrelu(h, w, s, b):
        y = jax.lax.conv_general_dilated(
            h, w, window_strides=(1, 1), padding="SAME",
            dimension_numbers=("NHWC", "HWIO", "NHWC"))
        y = y * s + b
        return jnp.where(y >= 0.0, y, NEG_SLOPE * y)

    x = conv_bn_lrelu(x, params["w1"], params["s1"], params["b1"])
    x = conv_bn_lrelu(x, params["w2"], params["s2"], params["b2"])
    return jnp.transpose(x, (0, 3, 1, 2))


if __name__ == "__main__":
    # Small shapes consistent with Encoder(in_channels, out_channels):
    # batch=2, in_channels=4, spatial=16x16, out_channels=8.
    N, CIN, H, W = 2, 4, 16, 16
    COUT = 8

    key = jax.random.PRNGKey(0)
    kx, kp = jax.random.split(key)
    x = jax.random.normal(kx, (N, CIN, H, W), jnp.float32)
    params = init_encoder_params(kp, CIN, COUT)

    fwd = jax.jit(functools.partial(encoder_forward, params=params))
    out = fwd(x)
    jax.block_until_ready(out)

    assert out.shape == (N, COUT, H // 2, W // 2), out.shape
    assert bool(jnp.all(jnp.isfinite(out)))

    ref = _reference_forward(x, params)
    max_err = float(jnp.max(jnp.abs(out - ref)))
    assert max_err < 5e-2, f"max abs error vs reference: {max_err}"

    print("KERNEL_OK")
</pallas_src>

<mosaic_0001>
module attributes {stable_mosaic.version = 11 : i64} {
  func.func @_encoder_fused_kernel(%arg0: i32, %arg1: memref<1x8x2x8x8xbf16, #tpu.memory_space<vmem>>, %arg2: memref<36x8xbf16, #tpu.memory_space<vmem>>, %arg3: memref<1x8xf32, #tpu.memory_space<vmem>>, %arg4: memref<1x8xf32, #tpu.memory_space<vmem>>, %arg5: memref<72x8xbf16, #tpu.memory_space<vmem>>, %arg6: memref<1x8xf32, #tpu.memory_space<vmem>>, %arg7: memref<1x8xf32, #tpu.memory_space<vmem>>, %arg8: memref<1x8x64xf32, #tpu.memory_space<vmem>>, %arg9: memref<10x10x4xf32, #tpu.memory_space<vmem>>, %arg10: memref<10x10x8xf32, #tpu.memory_space<vmem>>) attributes {dimension_semantics = [#tpu.dimension_semantics<parallel>], iteration_bounds = array<i64: 2>, scalar_prefetch = 0 : i64, scratch_operands = 2 : i64, tpu.core_type = #tpu.core_type<tc>, window_params = [{transform_indices = @transform_0, window_bounds = array<i64: 1, 8, 2, 8, 8>}, {pipeline_mode = #tpu.pipeline_mode<synchronous>, transform_indices = @transform_1, window_bounds = array<i64: 36, 8>}, {pipeline_mode = #tpu.pipeline_mode<synchronous>, transform_indices = @transform_2, window_bounds = array<i64: 1, 8>}, {pipeline_mode = #tpu.pipeline_mode<synchronous>, transform_indices = @transform_3, window_bounds = array<i64: 1, 8>}, {pipeline_mode = #tpu.pipeline_mode<synchronous>, transform_indices = @transform_4, window_bounds = array<i64: 72, 8>}, {pipeline_mode = #tpu.pipeline_mode<synchronous>, transform_indices = @transform_5, window_bounds = array<i64: 1, 8>}, {pipeline_mode = #tpu.pipeline_mode<synchronous>, transform_indices = @transform_6, window_bounds = array<i64: 1, 8>}, {transform_indices = @transform_7, window_bounds = array<i64: 1, 8, 64>}]} {
    %c0 = arith.constant 0 : index
    %c0_0 = arith.constant 0 : index
    %c0_1 = arith.constant 0 : index
    %c0_2 = arith.constant 0 : index
    %c0_3 = arith.constant 0 : index
    %0 = vector.load %arg1[%c0, %c0_0, %c0_1, %c0_2, %c0_3] : memref<1x8x2x8x8xbf16, #tpu.memory_space<vmem>>, vector<1x8x2x8x8xbf16>
    %1 = vector.shape_cast %0 : vector<1x8x2x8x8xbf16> to vector<8x2x8x8xbf16>
    %2 = arith.extf %1 : vector<8x2x8x8xbf16> to vector<8x2x8x8xf32>
    %3 = vector.extract_strided_slice %2 {offsets = [0, 0, 0, 0], sizes = [8, 1, 8, 8], strides = [1, 1, 1, 1]} : vector<8x2x8x8xf32> to vector<8x1x8x8xf32>
    %4 = vector.shape_cast %3 : vector<8x1x8x8xf32> to vector<8x8x8xf32>
    %5 = vector.extract_strided_slice %2 {offsets = [0, 1, 0, 0], sizes = [8, 1, 8, 8], strides = [1, 1, 1, 1]} : vector<8x2x8x8xf32> to vector<8x1x8x8xf32>
    %6 = vector.shape_cast %5 : vector<8x1x8x8xf32> to vector<8x8x8xf32>
    %7 = arith.maximumf %4, %6 : vector<8x8x8xf32>
    %8 = vector.extract_strided_slice %7 {offsets = [0, 0, 0], sizes = [8, 8, 4], strides = [1, 1, 1]} : vector<8x8x8xf32> to vector<8x8x4xf32>
    %9 = vector.extract_strided_slice %7 {offsets = [0, 0, 4], sizes = [8, 8, 4], strides = [1, 1, 1]} : vector<8x8x8xf32> to vector<8x8x4xf32>
    %10 = arith.maximumf %8, %9 : vector<8x8x4xf32>
    %cst = arith.constant 0.000000e+00 : f32
    %11 = vector.broadcast %cst : f32 to vector<10x10x4xf32>
    %c0_4 = arith.constant 0 : index
    %c0_5 = arith.constant 0 : index
    %c0_6 = arith.constant 0 : index
    %12 = vector.load %arg9[%c0_4, %c0_5, %c0_6] : memref<10x10x4xf32, #tpu.memory_space<vmem>>, vector<10x10x4xf32>
    tpu.vector_store %arg9[%c0_4, %c0_5, %c0_6], %11 {strides = array<i32>} : memref<10x10x4xf32, #tpu.memory_space<vmem>>, vector<10x10x4xf32>,
    %13 = vector.extract_strided_slice %10 {offsets = [0, 0, 0], sizes = [1, 8, 4], strides = [1, 1, 1]} : vector<8x8x4xf32> to vector<1x8x4xf32>
    %14 = vector.shape_cast %13 : vector<1x8x4xf32> to vector<8x4xf32>
    %c1 = arith.constant 1 : index
    %c1_7 = arith.constant 1 : index
    %c0_8 = arith.constant 0 : index
    %15 = vector.load %arg9[%c1, %c1_7, %c0_8] : memref<10x10x4xf32, #tpu.memory_space<vmem>>, vector<1x8x4xf32>
    %16 = vector.shape_cast %15 : vector<1x8x4xf32> to vector<8x4xf32>
    %17 = vector.shape_cast %14 : vector<8x4xf32> to vector<1x8x4xf32>
    tpu.vector_store %arg9[%c1, %c1_7, %c0_8], %17 {strides = array<i32>} : memref<10x10x4xf32, #tpu.memory_space<vmem>>, vector<1x8x4xf32>,
    %18 = vector.extract_strided_slice %10 {offsets = [1, 0, 0], sizes = [1, 8, 4], strides = [1, 1, 1]} : vector<8x8x4xf32> to vector<1x8x4xf32>
    %19 = vector.shape_cast %18 : vector<1x8x4xf32> to vector<8x4xf32>
    %c2 = arith.constant 2 : index
    %c1_9 = arith.constant 1 : index
    %c0_10 = arith.constant 0 : index
    %20 = vector.load %arg9[%c2, %c1_9, %c0_10] : memref<10x10x4xf32, #tpu.memory_space<vmem>>, vector<1x8x4xf32>
    %21 = vector.shape_cast %20 : vector<1x8x4xf32> to vector<8x4xf32>
    %22 = vector.shape_cast %19 : vector<8x4xf32> to vector<1x8x4xf32>
    tpu.vector_store %arg9[%c2, %c1_9, %c0_10], %22 {strides = array<i32>} : memref<10x10x4xf32, #tpu.memory_space<vmem>>, vector<1x8x4xf32>,
    %23 = vector.extract_strided_slice %10 {offsets = [2, 0, 0], sizes = [1, 8, 4], strides = [1, 1, 1]} : vector<8x8x4xf32> to vector<1x8x4xf32>
    %24 = vector.shape_cast %23 : vector<1x8x4xf32> to vector<8x4xf32>
    %c3 = arith.constant 3 : index
    %c1_11 = arith.constant 1 : index
    %c0_12 = arith.constant 0 : index
    %25 = vector.load %arg9[%c3, %c1_11, %c0_12] : memref<10x10x4xf32, #tpu.memory_space<vmem>>, vector<1x8x4xf32>
    %26 = vector.shape_cast %25 : vector<1x8x4xf32> to vector<8x4xf32>
    %27 = vector.shape_cast %24 : vector<8x4xf32> to vector<1x8x4xf32>
    tpu.vector_store %arg9[%c3, %c1_11, %c0_12], %27 {strides = array<i32>} : memref<10x10x4xf32, #tpu.memory_space<vmem>>, vector<1x8x4xf32>,
    %28 = vector.extract_strided_slice %10 {offsets = [3, 0, 0], sizes = [1, 8, 4], strides = [1, 1, 1]} : vector<8x8x4xf32> to vector<1x8x4xf32>
    %29 = vector.shape_cast %28 : vector<1x8x4xf32> to vector<8x4xf32>
    %c4 = arith.constant 4 : index
    %c1_13 = arith.constant 1 : index
    %c0_14 = arith.constant 0 : index
    %30 = vector.load %arg9[%c4, %c1_13, %c0_14] : memref<10x10x4xf32, #tpu.memory_space<vmem>>, vector<1x8x4xf32>
    %31 = vector.shape_cast %30 : vector<1x8x4xf32> to vector<8x4xf32>
    %32 = vector.shape_cast %29 : vector<8x4xf32> to vector<1x8x4xf32>
    tpu.vector_store %arg9[%c4, %c1_13, %c0_14], %32 {strides = array<i32>} : memref<10x10x4xf32, #tpu.memory_space<vmem>>, vector<1x8x4xf32>,
    %33 = vector.extract_strided_slice %10 {offsets = [4, 0, 0], sizes = [1, 8, 4], strides = [1, 1, 1]} : vector<8x8x4xf32> to vector<1x8x4xf32>
    %34 = vector.shape_cast %33 : vector<1x8x4xf32> to vector<8x4xf32>
    %c5 = arith.constant 5 : index
    %c1_15 = arith.constant 1 : index
    %c0_16 = arith.constant 0 : index
    %35 = vector.load %arg9[%c5, %c1_15, %c0_16] : memref<10x10x4xf32, #tpu.memory_space<vmem>>, vector<1x8x4xf32>
    %36 = vector.shape_cast %35 : vector<1x8x4xf32> to vector<8x4xf32>
    %37 = vector.shape_cast %34 : vector<8x4xf32> to vector<1x8x4xf32>
    tpu.vector_store %arg9[%c5, %c1_15, %c0_16], %37 {strides = array<i32>} : memref<10x10x4xf32, #tpu.memory_space<vmem>>, vector<1x8x4xf32>,
    %38 = vector.extract_strided_slice %10 {offsets = [5, 0, 0], sizes = [1, 8, 4], strides = [1, 1, 1]} : vector<8x8x4xf32> to vector<1x8x4xf32>
    %39 = vector.shape_cast %38 : vector<1x8x4xf32> to vector<8x4xf32>
    %c6 = arith.constant 6 : index
    %c1_17 = arith.constant 1 : index
    %c0_18 = arith.constant 0 : index
    %40 = vector.load %arg9[%c6, %c1_17, %c0_18] : memref<10x10x4xf32, #tpu.memory_space<vmem>>, vector<1x8x4xf32>
    %41 = vector.shape_cast %40 : vector<1x8x4xf32> to vector<8x4xf32>
    %42 = vector.shape_cast %39 : vector<8x4xf32> to vector<1x8x4xf32>
    tpu.vector_store %arg9[%c6, %c1_17, %c0_18], %42 {strides = array<i32>} : memref<10x10x4xf32, #tpu.memory_space<vmem>>, vector<1x8x4xf32>,
    %43 = vector.extract_strided_slice %10 {offsets = [6, 0, 0], sizes = [1, 8, 4], strides = [1, 1, 1]} : vector<8x8x4xf32> to vector<1x8x4xf32>
    %44 = vector.shape_cast %43 : vector<1x8x4xf32> to vector<8x4xf32>
    %c7 = arith.constant 7 : index
    %c1_19 = arith.constant 1 : index
    %c0_20 = arith.constant 0 : index
    %45 = vector.load %arg9[%c7, %c1_19, %c0_20] : memref<10x10x4xf32, #tpu.memory_space<vmem>>, vector<1x8x4xf32>
    %46 = vector.shape_cast %45 : vector<1x8x4xf32> to vector<8x4xf32>
    %47 = vector.shape_cast %44 : vector<8x4xf32> to vector<1x8x4xf32>
    tpu.vector_store %arg9[%c7, %c1_19, %c0_20], %47 {strides = array<i32>} : memref<10x10x4xf32, #tpu.memory_space<vmem>>, vector<1x8x4xf32>,
    %48 = vector.extract_strided_slice %10 {offsets = [7, 0, 0], sizes = [1, 8, 4], strides = [1, 1, 1]} : vector<8x8x4xf32> to vector<1x8x4xf32>
    %49 = vector.shape_cast %48 : vector<1x8x4xf32> to vector<8x4xf32>
    %c8 = arith.constant 8 : index
    %c1_21 = arith.constant 1 : index
    %c0_22 = arith.constant 0 : index
    %50 = vector.load %arg9[%c8, %c1_21, %c0_22] : memref<10x10x4xf32, #tpu.memory_space<vmem>>, vector<1x8x4xf32>
    %51 = vector.shape_cast %50 : vector<1x8x4xf32> to vector<8x4xf32>
    %52 = vector.shape_cast %49 : vector<8x4xf32> to vector<1x8x4xf32>
    tpu.vector_store %arg9[%c8, %c1_21, %c0_22], %52 {strides = array<i32>} : memref<10x10x4xf32, #tpu.memory_space<vmem>>, vector<1x8x4xf32>,
    %c0_23 = arith.constant 0 : index
    %c0_24 = arith.constant 0 : index
    %c0_25 = arith.constant 0 : index
    %53 = vector.load %arg9[%c0_23, %c0_24, %c0_25] : memref<10x10x4xf32, #tpu.memory_space<vmem>>, vector<10x10x4xf32>
    %54 = vector.extract_strided_slice %53 {offsets = [0, 0, 0], sizes = [8, 8, 4], strides = [1, 1, 1]} : vector<10x10x4xf32> to vector<8x8x4xf32>
    %55 = vector.shape_cast %54 : vector<8x8x4xf32> to vector<64x4xf32>
    %56 = vector.extract_strided_slice %53 {offsets = [0, 1, 0], sizes = [8, 8, 4], strides = [1, 1, 1]} : vector<10x10x4xf32> to vector<8x8x4xf32>
    %57 = vector.shape_cast %56 : vector<8x8x4xf32> to vector<64x4xf32>
    %58 = vector.extract_strided_slice %53 {offsets = [0, 2, 0], sizes = [8, 8, 4], strides = [1, 1, 1]} : vector<10x10x4xf32> to vector<8x8x4xf32>
    %59 = vector.shape_cast %58 : vector<8x8x4xf32> to vector<64x4xf32>
    %60 = vector.extract_strided_slice %53 {offsets = [1, 0, 0], sizes = [8, 8, 4], strides = [1, 1, 1]} : vector<10x10x4xf32> to vector<8x8x4xf32>
    %61 = vector.shape_cast %60 : vector<8x8x4xf32> to vector<64x4xf32>
    %62 = vector.extract_strided_slice %53 {offsets = [1, 1, 0], sizes = [8, 8, 4], strides = [1, 1, 1]} : vector<10x10x4xf32> to vector<8x8x4xf32>
    %63 = vector.shape_cast %62 : vector<8x8x4xf32> to vector<64x4xf32>
    %64 = vector.extract_strided_slice %53 {offsets = [1, 2, 0], sizes = [8, 8, 4], strides = [1, 1, 1]} : vector<10x10x4xf32> to vector<8x8x4xf32>
    %65 = vector.shape_cast %64 : vector<8x8x4xf32> to vector<64x4xf32>
    %66 = vector.extract_strided_slice %53 {offsets = [2, 0, 0], sizes = [8, 8, 4], strides = [1, 1, 1]} : vector<10x10x4xf32> to vector<8x8x4xf32>
    %67 = vector.shape_cast %66 : vector<8x8x4xf32> to vector<64x4xf32>
    %68 = vector.extract_strided_slice %53 {offsets = [2, 1, 0], sizes = [8, 8, 4], strides = [1, 1, 1]} : vector<10x10x4xf32> to vector<8x8x4xf32>
    %69 = vector.shape_cast %68 : vector<8x8x4xf32> to vector<64x4xf32>
    %70 = vector.extract_strided_slice %53 {offsets = [2, 2, 0], sizes = [8, 8, 4], strides = [1, 1, 1]} : vector<10x10x4xf32> to vector<8x8x4xf32>
    %71 = vector.shape_cast %70 : vector<8x8x4xf32> to vector<64x4xf32>
    %72 = tpu.concatenate %55, %57, %59, %61, %63, %65, %67, %69, %71 in 1 : vector<64x4xf32>, vector<64x4xf32>, vector<64x4xf32>, vector<64x4xf32>, vector<64x4xf32>, vector<64x4xf32>, vector<64x4xf32>, vector<64x4xf32>, vector<64x4xf32> -> vector<64x36xf32>
    %73 = arith.truncf %72 : vector<64x36xf32> to vector<64x36xbf16>
    %c0_26 = arith.constant 0 : index
    %c0_27 = arith.constant 0 : index
    %74 = vector.load %arg2[%c0_26, %c0_27] : memref<36x8xbf16, #tpu.memory_space<vmem>>, vector<36x8xbf16>
    %cst_28 = arith.constant dense<0.000000e+00> : vector<64x8xf32>
    %75 = tpu.matmul %73, %74, %cst_28 {dimension_numbers = #tpu.dot_dimension_numbers<[1], [0], [0], [1], [0, 0, 1, 1], [], []>} : vector<64x36xbf16>, vector<36x8xbf16>, vector<64x8xf32> -> vector<64x8xf32>
    %c0_29 = arith.constant 0 : index
    %c0_30 = arith.constant 0 : index
    %76 = vector.load %arg3[%c0_29, %c0_30] : memref<1x8xf32, #tpu.memory_space<vmem>>, vector<1x8xf32>
    %77 = vector.broadcast %76 : vector<1x8xf32> to vector<64x8xf32>
    %78 = arith.mulf %75, %77 : vector<64x8xf32>
    %c0_31 = arith.constant 0 : index
    %c0_32 = arith.constant 0 : index
    %79 = vector.load %arg4[%c0_31, %c0_32] : memref<1x8xf32, #tpu.memory_space<vmem>>, vector<1x8xf32>
    %80 = vector.broadcast %79 : vector<1x8xf32> to vector<64x8xf32>
    %81 = arith.addf %78, %80 : vector<64x8xf32>
    %cst_33 = arith.constant 0.000000e+00 : f32
    %82 = vector.broadcast %cst_33 : f32 to vector<64x8xf32>
    %83 = arith.cmpf oge, %81, %82 : vector<64x8xf32>
    %cst_34 = arith.constant 0.00999999977 : f32
    %84 = vector.broadcast %cst_34 : f32 to vector<64x8xf32>
    %85 = arith.mulf %84, %81 : vector<64x8xf32>
    %86 = arith.select %83, %81, %85 : vector<64x8xi1>, vector<64x8xf32>
    %cst_35 = arith.constant 0.000000e+00 : f32
    %87 = vector.broadcast %cst_35 : f32 to vector<10x10x8xf32>
    %c0_36 = arith.constant 0 : index
    %c0_37 = arith.constant 0 : index
    %c0_38 = arith.constant 0 : index
    %88 = vector.load %arg10[%c0_36, %c0_37, %c0_38] : memref<10x10x8xf32, #tpu.memory_space<vmem>>, vector<10x10x8xf32>
    tpu.vector_store %arg10[%c0_36, %c0_37, %c0_38], %87 {strides = array<i32>} : memref<10x10x8xf32, #tpu.memory_space<vmem>>, vector<10x10x8xf32>,
    %89 = vector.extract_strided_slice %86 {offsets = [0, 0], sizes = [8, 8], strides = [1, 1]} : vector<64x8xf32> to vector<8x8xf32>
    %c1_39 = arith.constant 1 : index
    %c1_40 = arith.constant 1 : index
    %c0_41 = arith.constant 0 : index
    %90 = vector.load %arg10[%c1_39, %c1_40, %c0_41] : memref<10x10x8xf32, #tpu.memory_space<vmem>>, vector<1x8x8xf32>
    %91 = vector.shape_cast %90 : vector<1x8x8xf32> to vector<8x8xf32>
    %92 = vector.shape_cast %89 : vector<8x8xf32> to vector<1x8x8xf32>
    tpu.vector_store %arg10[%c1_39, %c1_40, %c0_41], %92 {strides = array<i32>} : memref<10x10x8xf32, #tpu.memory_space<vmem>>, vector<1x8x8xf32>,
    %93 = vector.extract_strided_slice %86 {offsets = [8, 0], sizes = [8, 8], strides = [1, 1]} : vector<64x8xf32> to vector<8x8xf32>
    %c2_42 = arith.constant 2 : index
    %c1_43 = arith.constant 1 : index
    %c0_44 = arith.constant 0 : index
    %94 = vector.load %arg10[%c2_42, %c1_43, %c0_44] : memref<10x10x8xf32, #tpu.memory_space<vmem>>, vector<1x8x8xf32>
    %95 = vector.shape_cast %94 : vector<1x8x8xf32> to vector<8x8xf32>
    %96 = vector.shape_cast %93 : vector<8x8xf32> to vector<1x8x8xf32>
    tpu.vector_store %arg10[%c2_42, %c1_43, %c0_44], %96 {strides = array<i32>} : memref<10x10x8xf32, #tpu.memory_space<vmem>>, vector<1x8x8xf32>,
    %97 = vector.extract_strided_slice %86 {offsets = [16, 0], sizes = [8, 8], strides = [1, 1]} : vector<64x8xf32> to vector<8x8xf32>
    %c3_45 = arith.constant 3 : index
    %c1_46 = arith.constant 1 : index
    %c0_47 = arith.constant 0 : index
    %98 = vector.load %arg10[%c3_45, %c1_46, %c0_47] : memref<10x10x8xf32, #tpu.memory_space<vmem>>, vector<1x8x8xf32>
    %99 = vector.shape_cast %98 : vector<1x8x8xf32> to vector<8x8xf32>
    %100 = vector.shape_cast %97 : vector<8x8xf32> to vector<1x8x8xf32>
    tpu.vector_store %arg10[%c3_45, %c1_46, %c0_47], %100 {strides = array<i32>} : memref<10x10x8xf32, #tpu.memory_space<vmem>>, vector<1x8x8xf32>,
    %101 = vector.extract_strided_slice %86 {offsets = [24, 0], sizes = [8, 8], strides = [1, 1]} : vector<64x8xf32> to vector<8x8xf32>
    %c4_48 = arith.constant 4 : index
    %c1_49 = arith.constant 1 : index
    %c0_50 = arith.constant 0 : index
    %102 = vector.load %arg10[%c4_48, %c1_49, %c0_50] : memref<10x10x8xf32, #tpu.memory_space<vmem>>, vector<1x8x8xf32>
    %103 = vector.shape_cast %102 : vector<1x8x8xf32> to vector<8x8xf32>
    %104 = vector.shape_cast %101 : vector<8x8xf32> to vector<1x8x8xf32>
    tpu.vector_store %arg10[%c4_48, %c1_49, %c0_50], %104 {strides = array<i32>} : memref<10x10x8xf32, #tpu.memory_space<vmem>>, vector<1x8x8xf32>,
    %105 = vector.extract_strided_slice %86 {offsets = [32, 0], sizes = [8, 8], strides = [1, 1]} : vector<64x8xf32> to vector<8x8xf32>
    %c5_51 = arith.constant 5 : index
    %c1_52 = arith.constant 1 : index
    %c0_53 = arith.constant 0 : index
    %106 = vector.load %arg10[%c5_51, %c1_52, %c0_53] : memref<10x10x8xf32, #tpu.memory_space<vmem>>, vector<1x8x8xf32>
    %107 = vector.shape_cast %106 : vector<1x8x8xf32> to vector<8x8xf32>
    %108 = vector.shape_cast %105 : vector<8x8xf32> to vector<1x8x8xf32>
    tpu.vector_store %arg10[%c5_51, %c1_52, %c0_53], %108 {strides = array<i32>} : memref<10x10x8xf32, #tpu.memory_space<vmem>>, vector<1x8x8xf32>,
    %109 = vector.extract_strided_slice %86 {offsets = [40, 0], sizes = [8, 8], strides = [1, 1]} : vector<64x8xf32> to vector<8x8xf32>
    %c6_54 = arith.constant 6 : index
    %c1_55 = arith.constant 1 : index
    %c0_56 = arith.constant 0 : index
    %110 = vector.load %arg10[%c6_54, %c1_55, %c0_56] : memref<10x10x8xf32, #tpu.memory_space<vmem>>, vector<1x8x8xf32>
    %111 = vector.shape_cast %110 : vector<1x8x8xf32> to vector<8x8xf32>
    %112 = vector.shape_cast %109 : vector<8x8xf32> to vector<1x8x8xf32>
    tpu.vector_store %arg10[%c6_54, %c1_55, %c0_56], %112 {strides = array<i32>} : memref<10x10x8xf32, #tpu.memory_space<vmem>>, vector<1x8x8xf32>,
    %113 = vector.extract_strided_slice %86 {offsets = [48, 0], sizes = [8, 8], strides = [1, 1]} : vector<64x8xf32> to vector<8x8xf32>
    %c7_57 = arith.constant 7 : index
    %c1_58 = arith.constant 1 : index
    %c0_59 = arith.constant 0 : index
    %114 = vector.load %arg10[%c7_57, %c1_58, %c0_59] : memref<10x10x8xf32, #tpu.memory_space<vmem>>, vector<1x8x8xf32>
    %115 = vector.shape_cast %114 : vector<1x8x8xf32> to vector<8x8xf32>
    %116 = vector.shape_cast %113 : vector<8x8xf32> to vector<1x8x8xf32>
    tpu.vector_store %arg10[%c7_57, %c1_58, %c0_59], %116 {strides = array<i32>} : memref<10x10x8xf32, #tpu.memory_space<vmem>>, vector<1x8x8xf32>,
    %117 = vector.extract_strided_slice %86 {offsets = [56, 0], sizes = [8, 8], strides = [1, 1]} : vector<64x8xf32> to vector<8x8xf32>
    %c8_60 = arith.constant 8 : index
    %c1_61 = arith.constant 1 : index
    %c0_62 = arith.constant 0 : index
    %118 = vector.load %arg10[%c8_60, %c1_61, %c0_62] : memref<10x10x8xf32, #tpu.memory_space<vmem>>, vector<1x8x8xf32>
    %119 = vector.shape_cast %118 : vector<1x8x8xf32> to vector<8x8xf32>
    %120 = vector.shape_cast %117 : vector<8x8xf32> to vector<1x8x8xf32>
    tpu.vector_store %arg10[%c8_60, %c1_61, %c0_62], %120 {strides = array<i32>} : memref<10x10x8xf32, #tpu.memory_space<vmem>>, vector<1x8x8xf32>,
    %c0_63 = arith.constant 0 : index
    %c0_64 = arith.constant 0 : index
    %c0_65 = arith.constant 0 : index
    %121 = vector.load %arg10[%c0_63, %c0_64, %c0_65] : memref<10x10x8xf32, #tpu.memory_space<vmem>>, vector<10x10x8xf32>
    %122 = vector.extract_strided_slice %121 {offsets = [0, 0, 0], sizes = [8, 8, 8], strides = [1, 1, 1]} : vector<10x10x8xf32> to vector<8x8x8xf32>
    %123 = vector.shape_cast %122 : vector<8x8x8xf32> to vector<64x8xf32>
    %124 = vector.extract_strided_slice %121 {offsets = [0, 1, 0], sizes = [8, 8, 8], strides = [1, 1, 1]} : vector<10x10x8xf32> to vector<8x8x8xf32>
    %125 = vector.shape_cast %124 : vector<8x8x8xf32> to vector<64x8xf32>
    %126 = vector.extract_strided_slice %121 {offsets = [0, 2, 0], sizes = [8, 8, 8], strides = [1, 1, 1]} : vector<10x10x8xf32> to vector<8x8x8xf32>
    %127 = vector.shape_cast %126 : vector<8x8x8xf32> to vector<64x8xf32>
    %128 = vector.extract_strided_slice %121 {offsets = [1, 0, 0], sizes = [8, 8, 8], strides = [1, 1, 1]} : vector<10x10x8xf32> to vector<8x8x8xf32>
    %129 = vector.shape_cast %128 : vector<8x8x8xf32> to vector<64x8xf32>
    %130 = vector.extract_strided_slice %121 {offsets = [1, 1, 0], sizes = [8, 8, 8], strides = [1, 1, 1]} : vector<10x10x8xf32> to vector<8x8x8xf32>
    %131 = vector.shape_cast %130 : vector<8x8x8xf32> to vector<64x8xf32>
    %132 = vector.extract_strided_slice %121 {offsets = [1, 2, 0], sizes = [8, 8, 8], strides = [1, 1, 1]} : vector<10x10x8xf32> to vector<8x8x8xf32>
    %133 = vector.shape_cast %132 : vector<8x8x8xf32> to vector<64x8xf32>
    %134 = vector.extract_strided_slice %121 {offsets = [2, 0, 0], sizes = [8, 8, 8], strides = [1, 1, 1]} : vector<10x10x8xf32> to vector<8x8x8xf32>
    %135 = vector.shape_cast %134 : vector<8x8x8xf32> to vector<64x8xf32>
    %136 = vector.extract_strided_slice %121 {offsets = [2, 1, 0], sizes = [8, 8, 8], strides = [1, 1, 1]} : vector<10x10x8xf32> to vector<8x8x8xf32>
    %137 = vector.shape_cast %136 : vector<8x8x8xf32> to vector<64x8xf32>
    %138 = vector.extract_strided_slice %121 {offsets = [2, 2, 0], sizes = [8, 8, 8], strides = [1, 1, 1]} : vector<10x10x8xf32> to vector<8x8x8xf32>
    %139 = vector.shape_cast %138 : vector<8x8x8xf32> to vector<64x8xf32>
    %140 = tpu.concatenate %123, %125, %127, %129, %131, %133, %135, %137, %139 in 1 : vector<64x8xf32>, vector<64x8xf32>, vector<64x8xf32>, vector<64x8xf32>, vector<64x8xf32>, vector<64x8xf32>, vector<64x8xf32>, vector<64x8xf32>, vector<64x8xf32> -> vector<64x72xf32>
    %141 = arith.truncf %140 : vector<64x72xf32> to vector<64x72xbf16>
    %c0_66 = arith.constant 0 : index
    %c0_67 = arith.constant 0 : index
    %142 = vector.load %arg5[%c0_66, %c0_67] : memref<72x8xbf16, #tpu.memory_space<vmem>>, vector<72x8xbf16>
    %cst_68 = arith.constant dense<0.000000e+00> : vector<64x8xf32>
    %143 = tpu.matmul %141, %142, %cst_68 {dimension_numbers = #tpu.dot_dimension_numbers<[1], [0], [0], [1], [0, 0, 1, 1], [], []>} : vector<64x72xbf16>, vector<72x8xbf16>, vector<64x8xf32> -> vector<64x8xf32>
    %c0_69 = arith.constant 0 : index
    %c0_70 = arith.constant 0 : index
    %144 = vector.load %arg6[%c0_69, %c0_70] : memref<1x8xf32, #tpu.memory_space<vmem>>, vector<1x8xf32>
    %145 = vector.broadcast %144 : vector<1x8xf32> to vector<64x8xf32>
    %146 = arith.mulf %143, %145 : vector<64x8xf32>
    %c0_71 = arith.constant 0 : index
    %c0_72 = arith.constant 0 : index
    %147 = vector.load %arg7[%c0_71, %c0_72] : memref<1x8xf32, #tpu.memory_space<vmem>>, vector<1x8xf32>
    %148 = vector.broadcast %147 : vector<1x8xf32> to vector<64x8xf32>
    %149 = arith.addf %146, %148 : vector<64x8xf32>
    %cst_73 = arith.constant 0.000000e+00 : f32
    %150 = vector.broadcast %cst_73 : f32 to vector<64x8xf32>
    %151 = arith.cmpf oge, %149, %150 : vector<64x8xf32>
    %cst_74 = arith.constant 0.00999999977 : f32
    %152 = vector.broadcast %cst_74 : f32 to vector<64x8xf32>
    %153 = arith.mulf %152, %149 : vector<64x8xf32>
    %154 = arith.select %151, %149, %153 : vector<64x8xi1>, vector<64x8xf32>
    %155 = tpu.transpose %154, [1, 0] : vector<64x8xf32> -> vector<8x64xf32>
    %c0_75 = arith.constant 0 : index
    %c0_76 = arith.constant 0 : index
    %c0_77 = arith.constant 0 : index
    %156 = vector.load %arg8[%c0_75, %c0_76, %c0_77] : memref<1x8x64xf32, #tpu.memory_space<vmem>>, vector<1x8x64xf32>
    %157 = vector.shape_cast %156 : vector<1x8x64xf32> to vector<8x64xf32>
    %158 = vector.shape_cast %155 : vector<8x64xf32> to vector<1x8x64xf32>
    tpu.vector_store %arg8[%c0_75, %c0_76, %c0_77], %158 {strides = array<i32>} : memref<1x8x64xf32, #tpu.memory_space<vmem>>, vector<1x8x64xf32>,
    return
  }
  func.func @transform_0(%arg0: i32) -> (i32, i32, i32, i32, i32) {
    %c0_i32 = arith.constant 0 : i32
    %c0_i32_0 = arith.constant 0 : i32
    %c0_i32_1 = arith.constant 0 : i32
    %c0_i32_2 = arith.constant 0 : i32
    %c0_i32_3 = arith.constant 0 : i32
    return %arg0, %c0_i32, %c0_i32_0, %c0_i32_1, %c0_i32_2 : i32, i32, i32, i32, i32
  }
  func.func @transform_1(%arg0: i32) -> (i32, i32) {
    %c0_i32 = arith.constant 0 : i32
    %c0_i32_0 = arith.constant 0 : i32
    %c0_i32_1 = arith.constant 0 : i32
    return %c0_i32, %c0_i32_0 : i32, i32
  }
  func.func @transform_2(%arg0: i32) -> (i32, i32) {
    %c0_i32 = arith.constant 0 : i32
    %c0_i32_0 = arith.constant 0 : i32
    %c0_i32_1 = arith.constant 0 : i32
    return %c0_i32, %c0_i32_0 : i32, i32
  }
  func.func @transform_3(%arg0: i32) -> (i32, i32) {
    %c0_i32 = arith.constant 0 : i32
    %c0_i32_0 = arith.constant 0 : i32
    %c0_i32_1 = arith.constant 0 : i32
    return %c0_i32, %c0_i32_0 : i32, i32
  }
  func.func @transform_4(%arg0: i32) -> (i32, i32) {
    %c0_i32 = arith.constant 0 : i32
    %c0_i32_0 = arith.constant 0 : i32
    %c0_i32_1 = arith.constant 0 : i32
    return %c0_i32, %c0_i32_0 : i32, i32
  }
  func.func @transform_5(%arg0: i32) -> (i32, i32) {
    %c0_i32 = arith.constant 0 : i32
    %c0_i32_0 = arith.constant 0 : i32
    %c0_i32_1 = arith.constant 0 : i32
    return %c0_i32, %c0_i32_0 : i32, i32
  }
  func.func @transform_6(%arg0: i32) -> (i32, i32) {
    %c0_i32 = arith.constant 0 : i32
    %c0_i32_0 = arith.constant 0 : i32
    %c0_i32_1 = arith.constant 0 : i32
    return %c0_i32, %c0_i32_0 : i32, i32
  }
  func.func @transform_7(%arg0: i32) -> (i32, i32, i32) {
    %c0_i32 = arith.constant 0 : i32
    %c0_i32_0 = arith.constant 0 : i32
    %c0_i32_1 = arith.constant 0 : i32
    return %arg0, %c0_i32, %c0_i32_0 : i32, i32, i32
  }
}

</mosaic_0001>

<bundles_post_ra>
// kernel: encoder_forward.1
= control target key start
LH: loop header
LB: loop body
LE: loop exit
PB: predicated region body
PF: predicated region fallthrough
CT: control target
= control target key end

     0   :  { %s2020_s24 = smov 0   ;;  %s2558_s0 = inlined_call_operand.vmem [shape: bf16[2,8,2,8,8], index: 0, kind: input, shape index: {}]   ;;  %s2559_s1 = inlined_call_operand.vmem [shape: bf16[36,8], index: 1, kind: input, shape index: {}]   ;;  %s2560_s2 = inlined_call_operand.vmem [shape: f32[1,8], index: 2, kind: input, shape index: {}]   ;;  %s2561_s3 = inlined_call_operand.vmem [shape: f32[1,8], index: 3, kind: input, shape index: {}]   ;;  %s2562_s4 = inlined_call_operand.vmem [shape: bf16[72,8], index: 4, kind: input, shape index: {}]   ;;  %s2563_s5 = inlined_call_operand.vmem [shape: f32[1,8], index: 5, kind: input, shape index: {}]   ;;  %s2564_s6 = inlined_call_operand.vmem [shape: f32[1,8], index: 6, kind: input, shape index: {}]   ;;  %s2565_s7 = inlined_call_operand.vmem [shape: f32[2,8,64], index: 7, kind: output, shape index: {}]  }
   0x1 LB: > { %s1496_s25 = sadd.s32 4294967295, %s1964_s24   ;;  %p1500_p0 = scmp.ge.s32.totalorder %s1964_s24, 1  ;;  %s1964_s24 = sphi %s2020_s24, %s17_s24  }
   0x2   : > { %p237_p1 = scmp.lt.s32.totalorder %s1964_s24, 3 }
   0x4   : > { %p238_p2 = pnand %p1500_p0, %p237_p1 }
   0x5   : > { %p268_p3 = scmp.lt.s32.totalorder (!%p238_p2), %s1496_s25, 1  ;;  %s1967_s30 = smov (!%p238_p2), 124  }
   0x6   : > { %241 = sbr.rel (%p238_p2) target bundleno = 929 (0x3a1), region = 48  ;;  %s1968_s8 = smov (!%p238_p2), 24  }
   0x7   : > { %s1969_s9 = smov (!%p238_p2), 12   ;;  %s1970_s10 = smov (!%p238_p2), 16  }
   0x8   : > { %s1971_s11 = smov (!%p238_p2), 4   ;;  %s1972_s12 = smov (!%p238_p2), 28  }
   0x9   : > { %s1973_s13 = smov (!%p238_p2), 8   ;;  %s1974_s14 = smov (!%p238_p2), 20  }
   0xa   : > { %s1975_s15 = smov (!%p238_p2), 32   ;;  %s1976_s28 = smov (!%p238_p2), 40  }
   0xb   : > { %vm358_vm0 = vcmask 31744   ;;  %vm360_vm1 = vcmask 25600   ;;  %v1966_v0 = vmov 0.0   ;;  %s2567_s25 = smov (!%p268_p3, %s1496_s25), 1  ;;  %vm432_vm2 = vcmask 1046528  }
   0xc   : > { %364 = vst.msk [vmem:[#allocation2 + $0x20] sm:$0xff] %vm358_vm0, %v1966_v0  ;;  %s1538_s26 = sshll.u32 %s2567_s25, 6  ;;  %vm457_vm3 = vcmask 1045504   ;;  %vm698_vm4 = vcmask 64512   ;;  %vm798_vm5 = vcmask 1041408   ;;  %vm707_vm6 = vcmask 97280  }
   0xd   : > { %365 = vst.msk [vmem:[#allocation2 + $0x28] sm:$0x3] %vm360_vm1, %v1966_v0  ;;  %s272_s29 = scalar_lea.vmem %s2558_s0, %s1538_s26  ;;  %vm716_vm7 = vcmask 130048   ;;  %vm725_vm8 = vcmask 162816   ;;  %vm734_vm9 = vcmask 195584   ;;  %vm743_vm10 = vcmask 228352  }
   0xe   : > { %366 = vst.msk [vmem:[#allocation2 + $0x30] sm:$0xff] %vm358_vm0, %v1966_v0  ;;  %v1577_v1 = vld [vmem:[%s272_s29 + $0x8] sm:$0xff]   ;;  %v1578_v2 = vld [vmem:[%s272_s29 + $0x10] sm:$0xff]   ;;  %v1546_v3 = vld [vmem:[%s272_s29] sm:$0xff]   ;;  %vm752_vm11 = vcmask 261120   ;;  %vm785_vm12 = vcmask 293888  }
   0xf   : > { %367 = vst.msk [vmem:[#allocation2 + $0x38] sm:$0x3] %vm360_vm1, %v1966_v0  ;;  %v1551_v4 = vunpack.c.l.bf16 %v1577_v1  ;;  %v1552_v5 = vunpack.c.h.bf16 %v1577_v1  ;;  %v1555_v6 = vunpack.c.l.bf16 %v1578_v2  ;;  %v1556_v7 = vunpack.c.h.bf16 %v1578_v2  ;;  %v1581_v8 = vld [vmem:[%s272_s29 + $0x28] sm:$0xff]   ;;  %v1579_v9 = vld [vmem:[%s272_s29 + $0x18] sm:$0xff]   ;;  %v1580_v10 = vld [vmem:[%s272_s29 + $0x20] sm:$0xff]   ;;  %s1503_s23 = sshll.u32 %s2567_s25, 3 }
  0x10   : > { %359 = vst.msk [vmem:[#allocation2] sm:$0xff] %vm358_vm0, %v1966_v0  ;;  %v1547_v11 = vunpack.c.l.bf16 %v1546_v3  ;;  %v1548_v12 = vunpack.c.h.bf16 %v1546_v3  ;;  %v1567_v13 = vunpack.c.l.bf16 %v1581_v8  ;;  %v1568_v14 = vunpack.c.h.bf16 %v1581_v8  ;;  %v1582_v15 = vld [vmem:[%s272_s29 + $0x30] sm:$0xff]   ;;  %v1583_v20 = vld [vmem:[%s272_s29 + $0x38] sm:$0xff]   ;;  %s1977_s29 = smov 48  }
  0x11   : > { %361 = vst.msk [vmem:[#allocation2 + $0x8] sm:$0x3] %vm360_vm1, %v1966_v0  ;;  %v311_v16 = vmax.f32 %v1551_v4, %v1552_v5  ;;  %v312_v17 = vmax.f32 %v1555_v6, %v1556_v7  ;;  %v1559_v18 = vunpack.c.l.bf16 %v1579_v9  ;;  %v1560_v19 = vunpack.c.h.bf16 %v1579_v9 }
  0x12   : > { %362 = vst.msk [vmem:[#allocation2 + $0x10] sm:$0xff] %vm358_vm0, %v1966_v0  ;;  %v310_v21 = vmax.f32 %v1547_v11, %v1548_v12  ;;  %v315_v22 = vmax.f32 %v1567_v13, %v1568_v14  ;;  %v1563_v23 = vunpack.c.l.bf16 %v1580_v10  ;;  %v1564_v24 = vunpack.c.h.bf16 %v1580_v10 }
  0x13   : > { %363 = vst.msk [vmem:[#allocation2 + $0x18] sm:$0x3] %vm360_vm1, %v1966_v0  ;;  %v1614_v25 = vpack.i.bf16 %v312_v17, %v311_v16  ;;  %v1571_v26 = vunpack.c.l.bf16 %v1582_v15  ;;  %v1572_v27 = vunpack.c.h.bf16 %v1582_v15  ;;  %v1575_v29 = vunpack.c.l.bf16 %v1583_v20 }
  0x14   : > { %368 = vst.msk [vmem:[#allocation2 + $0x40] sm:$0xff] %vm358_vm0, %v1966_v0  ;;  %v1624_v28 = vpack.i.bf16 %v310_v21, %v315_v22  ;;  %v1576_v30 = vunpack.c.h.bf16 %v1583_v20  ;;  %v313_v31 = vmax.f32 %v1559_v18, %v1560_v19  ;;  %v314_v32 = vmax.f32 %v1563_v23, %v1564_v24 }
  0x15   : > { %369 = vst.msk [vmem:[#allocation2 + $0x48] sm:$0x3] %vm360_vm1, %v1966_v0  ;;  %1615 = vrot.lane.b32.xlu0 %v1614_v25, %s1967_s30  ;;  %v316_v33 = vmax.f32 %v1571_v26, %v1572_v27  ;;  %vm880_vm13 = vcmask 58368  }
  0x16   : > { %370 = vst.msk [vmem:[#allocation2 + $0x50] sm:$0xff] %vm358_vm0, %v1966_v0  ;;  %1625 = vrot.lane.b32.xlu1 %v1624_v28, %s1967_s30  ;;  %v317_v34 = vmax.f32 %v1575_v29, %v1576_v30  ;;  %v1619_v35 = vpack.i.bf16 %v314_v32, %v313_v31 }
  0x17   : > { %371 = vst.msk [vmem:[#allocation2 + $0x58] sm:$0x3] %vm360_vm1, %v1966_v0 }
  0x18   : > { %372 = vst.msk [vmem:[#allocation2 + $0x60] sm:$0xff] %vm358_vm0, %v1966_v0  ;;  %v1629_v36 = vpack.i.bf16 %v317_v34, %v316_v33 }
  0x19   : > { %373 = vst.msk [vmem:[#allocation2 + $0x68] sm:$0x3] %vm360_vm1, %v1966_v0 }
  0x1a   : > { %374 = vst.msk [vmem:[#allocation2 + $0x70] sm:$0xff] %vm358_vm0, %v1966_v0 }
  0x1b   : > { %375 = vst.msk [vmem:[#allocation2 + $0x78] sm:$0x3] %vm360_vm1, %v1966_v0 }
  0x1c   : > { %376 = vst.msk [vmem:[#allocation2 + $0x80] sm:$0xff] %vm358_vm0, %v1966_v0 }
  0x1d   : > { %377 = vst.msk [vmem:[#allocation2 + $0x88] sm:$0x3] %vm360_vm1, %v1966_v0  ;;  %1620 = vrot.lane.b32.xlu0 %v1619_v35, %s1967_s30 }
  0x1e   : > { %378 = vst.msk [vmem:[#allocation2 + $0x90] sm:$0xff] %vm358_vm0, %v1966_v0  ;;  %1630 = vrot.lane.b32.xlu1 %v1629_v36, %s1967_s30  ;;  %s1978_s30 = smov 56  }
  0x1f   : > { %379 = vst.msk [vmem:[#allocation2 + $0x98] sm:$0x3] %vm360_vm1, %v1966_v0 }
  0x20   : > { %879 = vst.msk [vmem:[#allocation3] sm:$0xff] %vm698_vm4, %v1966_v0 }
  0x21   : > { %882 = vst.msk [vmem:[#allocation3 + $0x10] sm:$0xff] %vm698_vm4, %v1966_v0 }
  0x22   : > { %884 = vst.msk [vmem:[#allocation3 + $0x20] sm:$0xff] %vm698_vm4, %v1966_v0 }
  0x23   : > { %886 = vst.msk [vmem:[#allocation3 + $0x30] sm:$0xff] %vm698_vm4, %v1966_v0 }
  0x24   : > { %888 = vst.msk [vmem:[#allocation3 + $0x40] sm:$0xff] %vm698_vm4, %v1966_v0 }
  0x25   : > { %890 = vst.msk [vmem:[#allocation3 + $0x50] sm:$0xff] %vm698_vm4, %v1966_v0 }
  0x26   : > { %892 = vst.msk [vmem:[#allocation3 + $0x60] sm:$0xff] %vm698_vm4, %v1966_v0 }
  0x27   : > { %894 = vst.msk [vmem:[#allocation3 + $0x70] sm:$0xff] %vm698_vm4, %v1966_v0 }
  0x28   : > { %896 = vst.msk [vmem:[#allocation3 + $0x80] sm:$0xff] %vm698_vm4, %v1966_v0 }
  0x29   : > { %898 = vst.msk [vmem:[#allocation3 + $0x90] sm:$0xff] %vm698_vm4, %v1966_v0 }
  0x2a   : > { %887 = vst.msk [vmem:[#allocation3 + $0x38] sm:$0x3] %vm880_vm13, %v1966_v0 }
  0x2b   : > { %881 = vst.msk [vmem:[#allocation3 + $0x8] sm:$0x3] %vm880_vm13, %v1966_v0 }
  0x2c   : > { %883 = vst.msk [vmem:[#allocation3 + $0x18] sm:$0x3] %vm880_vm13, %v1966_v0 }
  0x2d   : > { %885 = vst.msk [vmem:[#allocation3 + $0x28] sm:$0x3] %vm880_vm13, %v1966_v0 }
  0x2e   : > { %889 = vst.msk [vmem:[#allocation3 + $0x48] sm:$0x3] %vm880_vm13, %v1966_v0 }
  0x2f   : > { %891 = vst.msk [vmem:[#allocation3 + $0x58] sm:$0x3] %vm880_vm13, %v1966_v0 }
  0x30   : > { %893 = vst.msk [vmem:[#allocation3 + $0x68] sm:$0x3] %vm880_vm13, %v1966_v0 }
  0x31   : > { %895 = vst.msk [vmem:[#allocation3 + $0x78] sm:$0x3] %vm880_vm13, %v1966_v0 }
  0x32   : > { %897 = vst.msk [vmem:[#allocation3 + $0x88] sm:$0x3] %vm880_vm13, %v1966_v0 }
  0x33   : > { %899 = vst.msk [vmem:[#allocation3 + $0x98] sm:$0x3] %vm880_vm13, %v1966_v0  ;;  %vm1258_vm13 = vcmask 457728  }
  0x87   : > { %v1616_v37 = vpop.permute.xlu0 %1615 }
  0x88   : > { %v1618_v38 = vunpack.i.h.bf16 %v1616_v37  ;;  %v1617_v39 = vunpack.i.l.bf16 %v1616_v37  ;;  %v1626_v40 = vpop.permute.xlu1 %1625 }
  0x89   : > { %v1628_v41 = vunpack.i.h.bf16 %v1626_v40  ;;  %v1627_v42 = vunpack.i.l.bf16 %v1626_v40 }
  0x8a   : > { %v352_v43 = vmax.f32 %v312_v17, %v1618_v38  ;;  %v351_v44 = vmax.f32 %v311_v16, %v1617_v39 }
  0x8b   : > { %v350_v45 = vmax.f32 %v310_v21, %v1628_v41  ;;  %v355_v46 = vmax.f32 %v315_v22, %v1627_v42 }
  0x8c   : > { %385 = vst.msk [vmem:[#allocation2 + $0x31] sm:$0xff] %vm358_vm0, %v352_v43 }
  0x8d   : > { %383 = vst.msk [vmem:[#allocation2 + $0x21] sm:$0xff] %vm358_vm0, %v351_v44 }
  0x8e   : > { %381 = vst.msk [vmem:[#allocation2 + $0x11] sm:$0xff] %vm358_vm0, %v350_v45  ;;  %v2152_v45 = vld [vmem:[#allocation2] sm:$0xff] }
  0x8f   : > { %391 = vst.msk [vmem:[#allocation2 + $0x61] sm:$0xff] %vm358_vm0, %v355_v46  ;;  %v1621_v47 = vpop.permute.xlu0 %1620  ;;  %v397_v46 = vld [vmem:[#allocation2 + $0x8] sm:$0x3] }
  0x90   : > { %v1623_v48 = vunpack.i.h.bf16 %v1621_v47  ;;  %v1622_v49 = vunpack.i.l.bf16 %v1621_v47  ;;  %v1631_v50 = vpop.permute.xlu1 %1630 }
  0x91   : > { %v1633_v51 = vunpack.i.h.bf16 %v1631_v50  ;;  %v1632_v52 = vunpack.i.l.bf16 %v1631_v50  ;;  %v459_v50 = vrot.slane %v397_v46, 2 }
  0x92   : > { %v354_v53 = vmax.f32 %v314_v32, %v1623_v48  ;;  %v353_v54 = vmax.f32 %v313_v31, %v1622_v49  ;;  %v458_v49 = vrot.slane %v2152_v45, 2 }
  0x93   : > { %v2078_v55 = vld [vmem:[#allocation2 + $0x30] sm:$0xff]  ;;  %v357_v56 = vmax.f32 %v317_v34, %v1633_v51  ;;  %v356_v57 = vmax.f32 %v316_v33, %v1632_v52  ;;  %v403_v60 = vld [vmem:[#allocation2 + $0x38] sm:$0x3] }
  0x94   : > { %389 = vst.msk [vmem:[#allocation2 + $0x51] sm:$0xff] %vm358_vm0, %v354_v53  ;;  %v2081_v58 = vld [vmem:[#allocation2 + $0x20] sm:$0xff]  ;;  %v401_v62 = vld [vmem:[#allocation2 + $0x28] sm:$0x3]  ;;  %v442_v1 = vrot.slane %v2078_v55, 1  ;;  %v443_v2 = vrot.slane %v403_v60, 1  ;;  %v460_v53 = vsel %vm457_vm3, %v458_v49, %v459_v50 }
  0x95   : > { %387 = vst.msk [vmem:[#allocation2 + $0x41] sm:$0xff] %vm358_vm0, %v353_v54  ;;  %v1659_v59 = vpack.i.bf16 %v2078_v55, %v2081_v58  ;;  %v439_v6 = vrot.slane %v2081_v58, 1  ;;  %v440_v10 = vrot.slane %v401_v62, 1  ;;  %v464_v18 = vrot.slane %v2081_v58, 2  ;;  %v2146_v41 = vld [vmem:[#allocation2 + $0x10] sm:$0xff]  ;;  %v1540_v50 = vld [vmem:[%s2559_s1 + $0x8] sm:$0xff] }
  0x96   : > { %395 = vst.msk [vmem:[#allocation2 + $0x81] sm:$0xff] %vm358_vm0, %v357_v56  ;;  %v2089_v61 = vld [vmem:[#allocation2 + $0x60] sm:$0xff]  ;;  %v444_v12 = vsel %vm432_vm2, %v442_v1, %v443_v2  ;;  %v465_v20 = vrot.slane %v401_v62, 2  ;;  %v467_v21 = vrot.slane %v2078_v55, 2  ;;  %v468_v22 = vrot.slane %v403_v60, 2 }
  0x97   : > { %1660 = vrot.lane.b32.xlu1 %v1659_v59, %s1968_s8  ;;  %393 = vst.msk [vmem:[#allocation2 + $0x71] sm:$0xff] %vm358_vm0, %v356_v57  ;;  %v2107_v15 = vsel %vm432_vm2, %v439_v6, %v440_v10  ;;  %v409_v37 = vld [vmem:[#allocation2 + $0x68] sm:$0x3]  ;;  %v476_v39 = vrot.slane %v2089_v61, 2  ;;  %v1654_v43 = vpack.i.bf16 %v2081_v58, %v2146_v41  ;;  %v399_v48 = vld [vmem:[#allocation2 + $0x18] sm:$0x3] }
  0x98   : > { %v2113_v19 = vpack.i.bf16 %v444_v12, %v2107_v15  ;;  %v2126_v26 = vsel %vm457_vm3, %v464_v18, %v465_v20  ;;  %v469_v27 = vsel %vm457_vm3, %v467_v21, %v468_v22  ;;  %v477_v40 = vrot.slane %v409_v37, 2 }
  0x99   : > { %v2135_v33 = vpack.i.bf16 %v469_v27, %v2126_v26  ;;  %v461_v51 = vrot.slane %v2146_v41, 2  ;;  %v462_v52 = vrot.slane %v399_v48, 2  ;;  %v433_v54 = vrot.slane %v2152_v45, 1 }
  0x9a   : > { %v478_v44 = vsel %vm457_vm3, %v476_v39, %v477_v40  ;;  %v434_v56 = vrot.slane %v397_v46, 1  ;;  %v451_v57 = vrot.slane %v2089_v61, 1  ;;  %v452_v59 = vrot.slane %v409_v37, 1 }
  0x9b   : > { %v2091_v63 = vld [vmem:[#allocation2 + $0x50] sm:$0xff]  ;;  %v407_v11 = vld [vmem:[#allocation2 + $0x58] sm:$0x3]  ;;  %v463_v62 = vsel %vm457_vm3, %v461_v51, %v462_v52  ;;  %v436_v1 = vrot.slane %v2146_v41, 1  ;;  %v437_v2 = vrot.slane %v399_v48, 1  ;;  %v1539_v52 = vld [vmem:[%s2559_s1] sm:$0xff] }
  0x9c   : > { %v2094_v3 = vld [vmem:[#allocation2 + $0x40] sm:$0xff]  ;;  %v1644_v4 = vpack.i.bf16 %v2089_v61, %v2091_v63  ;;  %v405_v5 = vld [vmem:[#allocation2 + $0x48] sm:$0x3]  ;;  %v448_v16 = vrot.slane %v2091_v63, 1  ;;  %v449_v17 = vrot.slane %v407_v11, 1  ;;  %v473_v30 = vrot.slane %v2091_v63, 2 }
  0x9d   : > { %v1634_v7 = vpack.i.bf16 %v2094_v3, %v2078_v55  ;;  %v445_v8 = vrot.slane %v2094_v3, 1  ;;  %v446_v9 = vrot.slane %v405_v5, 1  ;;  %v1639_v23 = vpack.i.bf16 %v2091_v63, %v2094_v3  ;;  %v412_v21 = vld [vmem:[#allocation2 + $0x80] sm:$0xff]  ;;  %v413_v22 = vld [vmem:[#allocation2 + $0x88] sm:$0x3] }
  0x9e   : > { %1645 = vrot.lane.b32.xlu2 %v1644_v4, %s1969_s9  ;;  %v2119_v24 = vsel %vm432_vm2, %v448_v16, %v449_v17  ;;  %v470_v28 = vrot.slane %v2094_v3, 2  ;;  %v471_v29 = vrot.slane %v405_v5, 2  ;;  %v474_v31 = vrot.slane %v407_v11, 2  ;;  %v2132_v32 = vld [vmem:[#allocation2 + $0x70] sm:$0xff]  ;;  %v411_v60 = vld [vmem:[#allocation2 + $0x78] sm:$0x3] }
  0x9f   : > { %1635 = vrot.lane.b32.xlu0 %v1634_v7, %s1969_s9  ;;  %v447_v13 = vsel %vm432_vm2, %v445_v8, %v446_v9  ;;  %v1649_v34 = vpack.i.bf16 %v2132_v32, %v2089_v61  ;;  %v1719_v4 = vpack.i.bf16 %v463_v62, %v460_v53  ;;  %v435_v5 = vsel %vm432_vm2, %v433_v54, %v434_v56 }
  0xa0   : > { %v1674_v14 = vpack.i.bf16 %v447_v13, %v444_v12  ;;  %v1684_v25 = vpack.i.bf16 %v2119_v24, %v447_v13  ;;  %v472_v35 = vsel %vm457_vm3, %v470_v28, %v471_v29  ;;  %v475_v36 = vsel %vm457_vm3, %v473_v30, %v474_v31  ;;  %v414_v28 = vld [vmem:[#allocation2 + $0x90] sm:$0xff]  ;;  %v415_v29 = vld [vmem:[#allocation2 + $0x98] sm:$0x3] }
  0xa1   : > { %v1699_v38 = vpack.i.bf16 %v475_v36, %v472_v35  ;;  %v1679_v42 = vpack.i.bf16 %v472_v35, %v469_v27  ;;  %v1709_v47 = vpack.i.bf16 %v478_v44, %v475_v36  ;;  %v479_v6 = vrot.slane %v2132_v32, 2 }
  0xa2   : > { %1675 = vrot.lane.b32.xlu1 %v1674_v14, %s1970_s10  ;;  %v480_v7 = vrot.slane %v411_v60, 2  ;;  %v453_v8 = vsel %vm432_vm2, %v451_v57, %v452_v59  ;;  %v438_v9 = vsel %vm432_vm2, %v436_v1, %v437_v2  ;;  %v454_v13 = vrot.slane %v2132_v32, 1 }
  0xa3   : > { %v1714_v10 = vpack.i.bf16 %v438_v9, %v435_v5  ;;  %v1704_v11 = vpack.i.bf16 %v453_v8, %v2119_v24  ;;  %v455_v14 = vrot.slane %v411_v60, 1  ;;  %v1739_v20 = vpack.i.bf16 %v2126_v26, %v463_v62 }
  0xa4   : > { %v481_v12 = vsel %vm457_vm3, %v479_v6, %v480_v7  ;;  %v485_v24 = vrot.slane %v413_v22, 1  ;;  %v492_v30 = vrot.slane %v414_v28, 1  ;;  %v493_v31 = vrot.slane %v415_v29, 1 }
  0xa5   : > { %v1729_v16 = vpack.i.bf16 %v481_v12, %v478_v44  ;;  %v456_v17 = vsel %vm432_vm2, %v454_v13, %v455_v14  ;;  %v1759_v36 = vpack.i.bf16 %v414_v28, %v412_v21  ;;  %v487_v37 = vrot.slane %v412_v21, 2  ;;  %v769_v44 = vld [vmem:[%s2559_s1 + $0x10] sm:$0x3] }
  0xa6   : > { %1665 = vrot.lane.b32.xlu2 %v2113_v19, %s1971_s11  ;;  %v1724_v18 = vpack.i.bf16 %v456_v17, %v453_v8  ;;  %v494_v35 = vsel %vm432_vm2, %v492_v30, %v493_v31  ;;  %v496_v40 = vrot.slane %v415_v29, 2 }
  0xa7   : > { %1640 = vrot.lane.b32.xlu0 %v1639_v23, %s1968_s8  ;;  %v484_v23 = vrot.slane %v412_v21, 1 }
  0xa9   : > { %v486_v27 = vsel %vm432_vm2, %v484_v23, %v485_v24 }
  0xaa   : > { %1685 = vrot.lane.b32.xlu1 %v1684_v25, %s1972_s12  ;;  %v1774_v26 = vpack.i.bf16 %v486_v27, %v456_v17 }
  0xae   : > { %1670 = vrot.lane.b32.xlu2 %v2135_v33, %s1973_s13 }
  0xaf   : > { %1650 = vrot.lane.b32.xlu0 %v1649_v34, %s1968_s8  ;;  %v1754_v34 = vpack.i.bf16 %v412_v21, %v2132_v32 }
  0xb2   : > { %1700 = vrot.lane.b32.xlu1 %v1699_v38, %s1973_s13 }
  0xb6   : > { %1680 = vrot.lane.b32.xlu2 %v1679_v42, %s1974_s14 }
  0xb7   : > { %1655 = vrot.lane.b32.xlu0 %v1654_v43, %s1969_s9 }
  0xba   : > { %1710 = vrot.lane.b32.xlu1 %v1709_v47, %s1974_s14  ;;  %v779_v47 = vunpack.c.l.b16 %v769_v44 }
  0xbc   : > { %v782_v48 = vpack.c.b16 %v779_v47, %v779_v47 }
  0xbe   : > { %1690 = vrot.lane.b32.xlu2 %v1699_v38, %s1975_s15  ;;  %v800_v49 = vsel %vm798_vm5, %v782_v48, 0 }
  0xbf   : > { %1695 = vrot.lane.b32.xlu0 %v1684_v25, %s1971_s11  ;;  %v1734_v25 = vpack.i.bf16 %v2107_v15, %v438_v9  ;;  %v1784_v15 = vpack.i.bf16 %v494_v35, %v486_v27  ;;  %1584 = vmatpush.bf16.msra.mxu3 %v800_v49 }
  0xc0   : > { %807 = vmatpush.bf16.msra.mxu0 %v800_v49 }
  0xc2   : > { %1720 = vrot.lane.b32.xlu1 %v1719_v4, %s1973_s13 }
  0xc3   : > { %1585 = vmatpush.bf16.msra.mxu3 %v1540_v50 }
  0xc4   : > { %808 = vmatpush.bf16.msra.mxu0 %v1540_v50 }
  0xc6   : > { %1715 = vrot.lane.b32.xlu2 %v1714_v10, %s1971_s11 }
  0xc7   : > { %1705 = vrot.lane.b32.xlu0 %v1704_v11, %s1970_s10  ;;  %1586 = vmatpush.bf16.msra.mxu3 %v1539_v52 }
  0xc8   : > { %809 = vmatpush.bf16.msra.mxu0 %v1539_v52 }
  0xca   : > { %1730 = vrot.lane.b32.xlu1 %v1729_v16, %s1975_s15 }
  0xce   : > { %1725 = vrot.lane.b32.xlu2 %v1724_v18, %s1972_s12 }
  0xcf   : > { %1740 = vrot.lane.b32.xlu0 %v1739_v20, %s1974_s14 }
  0xd2   : > { %1765 = vrot.lane.b32.xlu1 %v1724_v18, %s1971_s11 }
  0xd6   : > { %1735 = vrot.lane.b32.xlu2 %v1734_v25, %s1970_s10 }
  0xd7   : > { %1750 = vrot.lane.b32.xlu0 %v2135_v33, %s1975_s15  ;;  %v488_v33 = vrot.slane %v413_v22, 2 }
  0xd9   : > { %v489_v38 = vsel %vm457_vm3, %v487_v37, %v488_v33 }
  0xda   : > { %1775 = vrot.lane.b32.xlu1 %v1774_v26, %s1970_s10  ;;  %v1779_v39 = vpack.i.bf16 %v489_v38, %v481_v12 }
  0xde   : > { %1745 = vrot.lane.b32.xlu2 %v2113_v19, %s1972_s12  ;;  %v495_v19 = vrot.slane %v414_v28, 2 }
  0xdf   : > { %1755 = vrot.lane.b32.xlu0 %v1754_v34, %s1969_s9  ;;  %s1979_s9 = smov 64  }
  0xe0   : > { %v497_v42 = vsel %vm457_vm3, %v495_v19, %v496_v40 }
  0xe1   : > { %v1789_v43 = vpack.i.bf16 %v497_v42, %v489_v38 }
  0xe2   : > { %1785 = vrot.lane.b32.xlu1 %v1784_v15, %s1972_s12 }
  0xe6   : > { %1770 = vrot.lane.b32.xlu2 %v1729_v16, %s1973_s13 }
  0xe7   : > { %1760 = vrot.lane.b32.xlu0 %v1759_v36, %s1968_s8 }
  0xee   : > { %1780 = vrot.lane.b32.xlu2 %v1779_v39, %s1974_s14 }
  0xf6   : > { %1790 = vrot.lane.b32.xlu2 %v1789_v43, %s1975_s15 }
  0xf8   : > { %v2222_v46 = vpop.permute.xlu2 %1645 }
 0x100   : > { %v1666_v51 = vpop.permute.xlu2 %1665 }
 0x101   : > { %v1668_v59 = vunpack.i.h.bf16 %v1666_v51  ;;  %v1667_v60 = vunpack.i.l.bf16 %v1666_v51 }
 0x103   : > { %v693_v8 = vsel %vm358_vm0, %v2078_v55, %v1668_v59  ;;  %v692_v9 = vsel %vm358_vm0, %v2081_v58, %v1667_v60  ;;  %v1647_v59 = vunpack.i.l.bf16 %v2222_v46 }
 0x108   : > { %v1671_v53 = vpop.permute.xlu2 %1670 }
 0x109   : > { %v2230_v54 = vpop.permute.xlu1 %1660  ;;  %v1673_v62 = vunpack.i.h.bf16 %v1671_v53  ;;  %v1672_v1 = vunpack.i.l.bf16 %v1671_v53 }
 0x10b   : > { %v701_v10 = vsel %vm698_vm4, %v692_v9, %v1672_v1  ;;  %v702_v11 = vsel %vm698_vm4, %v693_v8, %v1673_v62 }
 0x110   : > { %v1681_v56 = vpop.permute.xlu2 %1680 }
 0x111   : > { %v1636_v57 = vpop.permute.xlu0 %1635  ;;  %v1683_v21 = vunpack.i.h.bf16 %v1681_v56  ;;  %v1682_v58 = vunpack.i.l.bf16 %v1681_v56 }
 0x112   : > { %v1638_v4 = vunpack.i.h.bf16 %v1636_v57  ;;  %v1637_v5 = vunpack.i.l.bf16 %v1636_v57  ;;  %v1648_v57 = vunpack.i.h.bf16 %v2222_v46 }
 0x114   : > { %v1676_v2 = vpop.permute.xlu1 %1675  ;;  %v710_v13 = vsel %vm707_vm6, %v701_v10, %v1637_v5  ;;  %v711_v14 = vsel %vm707_vm6, %v702_v11, %v1638_v4 }
 0x115   : > { %v1678_v6 = vunpack.i.h.bf16 %v1676_v2  ;;  %v1677_v7 = vunpack.i.l.bf16 %v1676_v2 }
 0x117   : > { %v719_v17 = vsel %vm716_vm7, %v710_v13, %v1677_v7  ;;  %v720_v18 = vsel %vm716_vm7, %v711_v14, %v1678_v6 }
 0x118   : > { %v1691_v12 = vpop.permute.xlu2 %1690  ;;  %v728_v23 = vsel %vm725_vm8, %v719_v17, %v1682_v58  ;;  %v729_v24 = vsel %vm725_vm8, %v720_v18, %v1683_v21 }
 0x119   : > { %v1641_v16 = vpop.permute.xlu0 %1640  ;;  %v1693_v26 = vunpack.i.h.bf16 %v1691_v12  ;;  %v1692_v30 = vunpack.i.l.bf16 %v1691_v12 }
 0x11a   : > { %v1643_v55 = vunpack.i.h.bf16 %v1641_v16  ;;  %v1642_v20 = vunpack.i.l.bf16 %v1641_v16 }
 0x11c   : > { %v1686_v22 = vpop.permute.xlu1 %1685  ;;  %v737_v28 = vsel %vm734_vm9, %v728_v23, %v1642_v20  ;;  %v738_v29 = vsel %vm734_vm9, %v729_v24, %v1643_v55 }
 0x11d   : > { %v1688_v25 = vunpack.i.h.bf16 %v1686_v22  ;;  %v1687_v27 = vunpack.i.l.bf16 %v1686_v22 }
 0x11f   : > { %v746_v31 = vsel %vm743_vm10, %v737_v28, %v1687_v27  ;;  %v747_v34 = vsel %vm743_vm10, %v738_v29, %v1688_v25 }
 0x120   : > { %v1716_v35 = vpop.permute.xlu2 %1715  ;;  %v755_v15 = vsel %vm752_vm11, %v746_v31, %v1692_v30  ;;  %v756_v36 = vsel %vm752_vm11, %v747_v34, %v1693_v26 }
 0x121   : > { %v1651_v37 = vpop.permute.xlu0 %1650  ;;  %v762_v33 = vpack.c.bf16 %v756_v36, %v755_v15  ;;  %v1718_v49 = vunpack.i.h.bf16 %v1716_v35  ;;  %v1717_v50 = vunpack.i.l.bf16 %v1716_v35 }
 0x122   : > { %v1653_v1 = vunpack.i.h.bf16 %v1651_v37  ;;  %v1652_v2 = vunpack.i.l.bf16 %v1651_v37 }
 0x123   : > { %1513 = vmatmul.msk.bf16.vlgmr.msra.gmra.mxu3 %vm785_vm12, %v762_v33  ;;  %v691_v4 = vsel %vm358_vm0, %v2146_v41, %v1718_v49 }
 0x124   : > { %v1701_v38 = vpop.permute.xlu1 %1700 }
 0x125   : > { %v1703_v53 = vunpack.i.h.bf16 %v1701_v38  ;;  %v1702_v56 = vunpack.i.l.bf16 %v1701_v38 }
 0x128   : > { %v1726_v39 = vpop.permute.xlu2 %1725 }
 0x129   : > { %v1656_v19 = vpop.permute.xlu0 %1655  ;;  %v1728_v13 = vunpack.i.h.bf16 %v1726_v39  ;;  %v1727_v14 = vunpack.i.l.bf16 %v1726_v39 }
 0x12a   : > { %v1658_v24 = vunpack.i.h.bf16 %v1656_v19  ;;  %v1657_v25 = vunpack.i.l.bf16 %v1656_v19 }
 0x12c   : > { %v1711_v40 = vpop.permute.xlu1 %1710 }
 0x12d   : > { %v1713_v9 = vunpack.i.h.bf16 %v1711_v40  ;;  %v1712_v10 = vunpack.i.l.bf16 %v1711_v40 }
 0x130   : > { %v1736_v43 = vpop.permute.xlu2 %1735 }
 0x131   : > { %v1696_v42 = vpop.permute.xlu0 %1695  ;;  %v1738_v15 = vunpack.i.h.bf16 %v1736_v43  ;;  %v1737_v36 = vunpack.i.l.bf16 %v1736_v43 }
 0x132   : > { %v1698_v44 = vunpack.i.h.bf16 %v1696_v42  ;;  %v1697_v47 = vunpack.i.l.bf16 %v1696_v42 }
 0x134   : > { %v1721_v48 = vpop.permute.xlu1 %1720  ;;  %v695_v51 = vsel %vm358_vm0, %v2091_v63, %v1698_v44  ;;  %v694_v52 = vsel %vm358_vm0, %v2094_v3, %v1697_v47  ;;  %v690_v63 = vsel %vm358_vm0, %v2152_v45, %v1717_v50  ;;  %v1663_v47 = vunpack.i.h.bf16 %v2230_v54 }
 0x135   : > { %v704_v60 = vsel %vm698_vm4, %v695_v51, %v1703_v53  ;;  %v703_v62 = vsel %vm698_vm4, %v694_v52, %v1702_v56  ;;  %v1723_v3 = vunpack.i.h.bf16 %v1721_v48  ;;  %v1722_v6 = vunpack.i.l.bf16 %v1721_v48 }
 0x136   : > { %v712_v11 = vsel %vm707_vm6, %v703_v62, %v1647_v59  ;;  %v713_v12 = vsel %vm707_vm6, %v704_v60, %v1648_v57  ;;  %v1662_v48 = vunpack.i.l.bf16 %v2230_v54 }
 0x137   : > { %v700_v21 = vsel %vm698_vm4, %v691_v4, %v1723_v3  ;;  %v699_v58 = vsel %vm698_vm4, %v690_v63, %v1722_v6 }
 0x138   : > { %v1746_v46 = vpop.permute.xlu2 %1745  ;;  %v709_v30 = vsel %vm707_vm6, %v700_v21, %v1658_v24  ;;  %v708_v31 = vsel %vm707_vm6, %v699_v58, %v1657_v25 }
 0x139   : > { %v1706_v5 = vpop.permute.xlu0 %1705  ;;  %v717_v38 = vsel %vm716_vm7, %v708_v31, %v1737_v36  ;;  %v718_v39 = vsel %vm716_vm7, %v709_v30, %v1738_v15  ;;  %v1748_v50 = vunpack.i.h.bf16 %v1746_v46  ;;  %v1747_v51 = vunpack.i.l.bf16 %v1746_v46  ;;  %v2325_v15 = vld [vmem:[%s2560_s2] ss:$0 sm:$0xff] }
 0x13a   : > { %v1708_v7 = vunpack.i.h.bf16 %v1706_v5  ;;  %v1707_v8 = vunpack.i.l.bf16 %v1706_v5  ;;  %v2330_v36 = vld [vmem:[%s2561_s3] ss:$0 sm:$0xff] }
 0x13c   : > { %v722_v16 = vsel %vm716_vm7, %v713_v12, %v1708_v7  ;;  %v721_v41 = vsel %vm716_vm7, %v712_v11, %v1707_v8  ;;  %v1731_v17 = vpop.permute.xlu1 %1730 }
 0x13d   : > { %v731_v45 = vsel %vm725_vm8, %v722_v16, %v1713_v9  ;;  %v730_v18 = vsel %vm725_vm8, %v721_v41, %v1712_v10  ;;  %v1733_v55 = vunpack.i.h.bf16 %v1731_v17  ;;  %v1732_v20 = vunpack.i.l.bf16 %v1731_v17 }
 0x13e   : > { %v739_v22 = vsel %vm734_vm9, %v730_v18, %v1652_v2  ;;  %v740_v23 = vsel %vm734_vm9, %v731_v45, %v1653_v1 }
 0x13f   : > { %v748_v27 = vsel %vm743_vm10, %v739_v22, %v1727_v14  ;;  %v749_v28 = vsel %vm743_vm10, %v740_v23, %v1728_v13 }
 0x140   : > { %v757_v29 = vsel %vm752_vm11, %v748_v27, %v1732_v20  ;;  %v758_v26 = vsel %vm752_vm11, %v749_v28, %v1733_v55  ;;  %v1771_v40 = vpop.permute.xlu2 %1770 }
 0x141   : > { %v1741_v34 = vpop.permute.xlu0 %1740  ;;  %v763_v35 = vpack.c.bf16 %v758_v26, %v757_v29  ;;  %v1773_v7 = vunpack.i.h.bf16 %v1771_v40  ;;  %v1772_v8 = vunpack.i.l.bf16 %v1771_v40 }
 0x142   : > { %v1743_v37 = vunpack.i.h.bf16 %v1741_v34  ;;  %v1742_v33 = vunpack.i.l.bf16 %v1741_v34 }
 0x143   : > { %1514 = vmatmul.msk.bf16.gmra.mxu3 %vm785_vm12, %v763_v35 }
 0x144   : > { %v1766_v19 = vpop.permute.xlu1 %1765  ;;  %v727_v42 = vsel %vm725_vm8, %v718_v39, %v1743_v37  ;;  %v726_v44 = vsel %vm725_vm8, %v717_v38, %v1742_v33 }
 0x145   : > { %v736_v43 = vsel %vm734_vm9, %v727_v42, %v1663_v47  ;;  %v735_v49 = vsel %vm734_vm9, %v726_v44, %v1662_v48  ;;  %v1768_v1 = vunpack.i.h.bf16 %v1766_v19  ;;  %v1767_v2 = vunpack.i.l.bf16 %v1766_v19 }
 0x146   : > { %v744_v57 = vsel %vm743_vm10, %v735_v49, %v1747_v51  ;;  %v745_v59 = vsel %vm743_vm10, %v736_v43, %v1748_v50 }
 0x147   : > { %v697_v5 = vsel %vm358_vm0, %v2132_v32, %v1768_v1  ;;  %v696_v3 = vsel %vm358_vm0, %v2089_v61, %v1767_v2 }
 0x148   : > { %v1781_v63 = vpop.permute.xlu2 %1780  ;;  %v705_v46 = vsel %vm698_vm4, %v696_v3, %v1772_v8  ;;  %v706_v11 = vsel %vm698_vm4, %v697_v5, %v1773_v7 }
 0x149   : > { %v1751_v52 = vpop.permute.xlu0 %1750  ;;  %v1783_v17 = vunpack.i.h.bf16 %v1781_v63  ;;  %v1782_v45 = vunpack.i.l.bf16 %v1781_v63  ;;  %v917_v63 = vld [vmem:[#allocation3 + $0x8] sm:$0x3] }
 0x14a   : > { %v1753_v53 = vunpack.i.h.bf16 %v1751_v52  ;;  %v1752_v56 = vunpack.i.l.bf16 %v1751_v52  ;;  %v977_v8 = vrot.slane %v917_v63, 2 }
 0x14c   : > { %v753_v60 = vsel %vm752_vm11, %v744_v57, %v1752_v56  ;;  %v754_v62 = vsel %vm752_vm11, %v745_v59, %v1753_v53  ;;  %v1776_v4 = vpop.permute.xlu1 %1775 }
 0x14d   : > { %v761_v54 = vpack.c.bf16 %v754_v62, %v753_v60  ;;  %v1778_v14 = vunpack.i.h.bf16 %v1776_v4  ;;  %v1777_v16 = vunpack.i.l.bf16 %v1776_v4 }
 0x14f   : > { %1512 = vmatmul.msk.bf16.vlgmr.msra.gmra.mxu0 %vm785_vm12, %v761_v54  ;;  %v2345_v54 = vld [vmem:[#allocation3] sm:$0xff] }
 0x150   : > { %v1791_v18 = vpop.permute.xlu2 %1790 }
 0x151   : > { %v1756_v6 = vpop.permute.xlu0 %1755  ;;  %v1793_v25 = vunpack.i.h.bf16 %v1791_v18  ;;  %v1792_v27 = vunpack.i.l.bf16 %v1791_v18 }
 0x152   : > { %v1758_v9 = vunpack.i.h.bf16 %v1756_v6  ;;  %v1757_v10 = vunpack.i.l.bf16 %v1756_v6  ;;  %v976_v6 = vrot.slane %v2345_v54, 2 }
 0x154   : > { %v715_v12 = vsel %vm707_vm6, %v706_v11, %v1758_v9  ;;  %v714_v13 = vsel %vm707_vm6, %v705_v46, %v1757_v10  ;;  %v1786_v61 = vpop.permute.xlu1 %1785  ;;  %v952_v9 = vrot.slane %v2345_v54, 1  ;;  %v953_v10 = vrot.slane %v917_v63, 1 }
 0x155   : > { %v724_v32 = vsel %vm716_vm7, %v715_v12, %v1778_v14  ;;  %v723_v41 = vsel %vm716_vm7, %v714_v13, %v1777_v16  ;;  %v1788_v58 = vunpack.i.h.bf16 %v1786_v61  ;;  %v1787_v22 = vunpack.i.l.bf16 %v1786_v61 }
 0x156   : > { %v732_v23 = vsel %vm725_vm8, %v723_v41, %v1782_v45  ;;  %v733_v24 = vsel %vm725_vm8, %v724_v32, %v1783_v17  ;;  %v978_v14 = vsel %vm457_vm3, %v976_v6, %v977_v8  ;;  %v954_v16 = vsel %vm432_vm2, %v952_v9, %v953_v10 }
 0x159   : > { %v1761_v55 = vpop.permute.xlu0 %1760 }
 0x15a   : > { %v1763_v20 = vunpack.i.h.bf16 %v1761_v55  ;;  %v1762_v21 = vunpack.i.l.bf16 %v1761_v55 }
 0x15c   : > { %v741_v28 = vsel %vm734_vm9, %v732_v23, %v1762_v21  ;;  %v742_v29 = vsel %vm734_vm9, %v733_v24, %v1763_v20 }
 0x15d   : > { %v750_v26 = vsel %vm743_vm10, %v741_v28, %v1787_v22  ;;  %v751_v30 = vsel %vm743_vm10, %v742_v29, %v1788_v58 }
 0x15e   : > { %v759_v31 = vsel %vm752_vm11, %v750_v26, %v1792_v27  ;;  %v760_v34 = vsel %vm752_vm11, %v751_v30, %v1793_v25 }
 0x15f   : > { %v764_v35 = vpack.c.bf16 %v760_v34, %v759_v31 }
 0x161   : > { %1515 = vmatmul.msk.bf16.gmra.mxu3 %vm785_vm12, %v764_v35  ;;  %vm1329_vm12 = vcmask 1043456  }
 0x1a6   : > { %v816_v37 = vpop.f32.mrf.mxu3 }
 0x1a7   : > { %v837_v33 = vmul.f32 %v2325_v15, %v816_v37 }
 0x1a9   : > { %v849_v38 = vadd.f32 %v2330_v36, %v837_v33 }
 0x1ab   : > { %vm857_vm14 = vcmp.ge.f32.partialorder %v849_v38, 0.0  ;;  %v865_v39 = vmul.f32 0.01, %v849_v38 }
 0x1ad   : > { %v873_v19 = vsel %vm857_vm14, %v849_v38, %v865_v39  ;;  %vm1267_vm14 = vcmask 523264  }
 0x1ae   : > { %905 = vst.msk [vmem:[#allocation3 + $0x31] sm:$0xff] %vm698_vm4, %v873_v19  ;;  %v818_v0 = vpop.f32.mrf.mxu3 }
 0x1af   : > { %v838_v40 = vmul.f32 %v2325_v15, %v818_v0 }
 0x1b1   : > { %v850_v42 = vadd.f32 %v2330_v36, %v838_v40 }
 0x1b3   : > { %vm858_vm15 = vcmp.ge.f32.partialorder %v850_v42, 0.0  ;;  %v866_v44 = vmul.f32 0.01, %v850_v42 }
 0x1b5   : > { %v874_v47 = vsel %vm858_vm15, %v850_v42, %v866_v44  ;;  %v2375_v35 = vld [vmem:[#allocation3 + $0x30] sm:$0xff]  ;;  %v923_v37 = vld [vmem:[#allocation3 + $0x38] sm:$0x3]  ;;  %vm1316_vm15 = vcmask 588800  }
 0x1b6   : > { %907 = vst.msk [vmem:[#allocation3 + $0x41] sm:$0xff] %vm698_vm4, %v874_v47  ;;  %v961_v39 = vrot.slane %v2375_v35, 1  ;;  %v962_v19 = vrot.slane %v923_v37, 1  ;;  %v985_v40 = vrot.slane %v2375_v35, 2  ;;  %v986_v42 = vrot.slane %v923_v37, 2 }
 0x1c6   : > { %v821_v48 = vpop.f32.mrf.mxu3 }
 0x1c7   : > { %v839_v43 = vmul.f32 %v2325_v15, %v821_v48 }
 0x1c9   : > { %v851_v49 = vadd.f32 %v2330_v36, %v839_v43  ;;  %v963_v43 = vsel %vm432_vm2, %v961_v39, %v962_v19 }
 0x1cb   : > { %vm859_vm0 = vcmp.ge.f32.partialorder %v851_v49, 0.0  ;;  %v867_v50 = vmul.f32 0.01, %v851_v49 }
 0x1cc   : > { %v811_v51 = vpop.f32.mrf.mxu0 }
 0x1cd   : > { %v875_v52 = vsel %vm859_vm0, %v851_v49, %v867_v50  ;;  %v835_v53 = vmul.f32 %v2325_v15, %v811_v51  ;;  %v987_v51 = vsel %vm457_vm3, %v985_v40, %v986_v42 }
 0x1ce   : > { %909 = vst.msk [vmem:[#allocation3 + $0x51] sm:$0xff] %vm698_vm4, %v875_v52  ;;  %v823_v56 = vpop.f32.mrf.mxu3 }
 0x1cf   : > { %v847_v57 = vadd.f32 %v2330_v36, %v835_v53  ;;  %v840_v59 = vmul.f32 %v2325_v15, %v823_v56  ;;  %v925_v56 = vld [vmem:[#allocation3 + $0x48] sm:$0x3] }
 0x1d1   : > { %vm855_vm1 = vcmp.ge.f32.partialorder %v847_v57, 0.0  ;;  %v863_v60 = vmul.f32 0.01, %v847_v57  ;;  %v852_v62 = vadd.f32 %v2330_v36, %v840_v59  ;;  %v989_v59 = vrot.slane %v925_v56, 2 }
 0x1d3   : > { %v871_v1 = vsel %vm855_vm1, %v847_v57, %v863_v60  ;;  %vm860_vm5 = vcmp.ge.f32.partialorder %v852_v62, 0.0  ;;  %v868_v2 = vmul.f32 0.01, %v852_v62 }
 0x1d4   : > { %901 = vst.msk [vmem:[#allocation3 + $0x11] sm:$0xff] %vm698_vm4, %v871_v1  ;;  %v813_v4 = vpop.f32.mrf.mxu0  ;;  %v965_v1 = vrot.slane %v925_v56, 1 }
 0x1d5   : > { %v876_v5 = vsel %vm860_vm5, %v852_v62, %v868_v2  ;;  %v836_v3 = vmul.f32 %v2325_v15, %v813_v4  ;;  %v2402_v4 = vld [vmem:[#allocation3 + $0x50] sm:$0xff]  ;;  %v927_v63 = vld [vmem:[#allocation3 + $0x58] sm:$0x3] }
 0x1d6   : > { %911 = vst.msk [vmem:[#allocation3 + $0x61] sm:$0xff] %vm698_vm4, %v876_v5  ;;  %v991_v6 = vrot.slane %v2402_v4, 2 }
 0x1d7   : > { %v848_v7 = vadd.f32 %v2330_v36, %v836_v3 }
 0x1d9   : > { %vm856_vm6 = vcmp.ge.f32.partialorder %v848_v7, 0.0  ;;  %v864_v46 = vmul.f32 0.01, %v848_v7 }
 0x1db   : > { %v872_v11 = vsel %vm856_vm6, %v848_v7, %v864_v46  ;;  %v2353_v12 = vld [vmem:[#allocation3 + $0x10] sm:$0xff]  ;;  %v919_v13 = vld [vmem:[#allocation3 + $0x18] sm:$0x3]  ;;  %v992_v7 = vrot.slane %v927_v63, 2  ;;  %v967_v46 = vrot.slane %v2402_v4, 1 }
 0x1dc   : > { %903 = vst.msk [vmem:[#allocation3 + $0x21] sm:$0xff] %vm698_vm4, %v872_v11  ;;  %v979_v32 = vrot.slane %v2353_v12, 2  ;;  %v980_v41 = vrot.slane %v919_v13, 2  ;;  %v955_v61 = vrot.slane %v2353_v12, 1  ;;  %v956_v17 = vrot.slane %v919_v13, 1 }
 0x1dd   : > { %v993_v10 = vsel %vm457_vm3, %v991_v6, %v992_v7  ;;  %v968_v11 = vrot.slane %v927_v63, 1  ;;  %v1544_v6 = vld [vmem:[%s2562_s4 + $0x18] sm:$0xff]  ;;  %v1543_v7 = vld [vmem:[%s2562_s4 + $0x10] sm:$0xff] }
 0x1de   : > { %v981_v45 = vsel %vm457_vm3, %v979_v32, %v980_v41  ;;  %v957_v18 = vsel %vm432_vm2, %v955_v61, %v956_v17  ;;  %v929_v32 = vld [vmem:[#allocation3 + $0x68] sm:$0x3] }
 0x1df   : > { %v1799_v55 = vpack.i.bf16 %v981_v45, %v978_v14  ;;  %v1794_v20 = vpack.i.bf16 %v957_v18, %v954_v16  ;;  %v969_v14 = vsel %vm432_vm2, %v967_v46, %v968_v11  ;;  %v2415_v16 = vld [vmem:[#allocation3 + $0x60] sm:$0xff]  ;;  %v995_v17 = vrot.slane %v929_v32, 2 }
 0x1e0   : > { %v994_v61 = vrot.slane %v2415_v16, 2 }
 0x1e1   : > { %1800 = vrot.lane.b32.xlu1 %v1799_v55, %s1970_s10  ;;  %1795 = vrot.lane.b32.xlu0 %v1794_v20, %s1973_s13  ;;  %v971_v55 = vrot.slane %v929_v32, 1 }
 0x1e3   : > { %v2364_v21 = vld [vmem:[#allocation3 + $0x20] sm:$0xff]  ;;  %v921_v58 = vld [vmem:[#allocation3 + $0x28] sm:$0x3] }
 0x1e4   : > { %v826_v22 = vpop.f32.mrf.mxu3  ;;  %v1804_v23 = vpack.i.bf16 %v2364_v21, %v2353_v12  ;;  %v982_v24 = vrot.slane %v2364_v21, 2  ;;  %v983_v25 = vrot.slane %v921_v58, 2  ;;  %v958_v27 = vrot.slane %v2364_v21, 1 }
 0x1e5   : > { %v841_v28 = vmul.f32 %v2325_v15, %v826_v22  ;;  %v959_v29 = vrot.slane %v921_v58, 1  ;;  %v1809_v47 = vpack.i.bf16 %v2375_v35, %v2364_v21  ;;  %v1884_v22 = vpack.i.bf16 %v2415_v16, %v2402_v4 }
 0x1e6   : > { %1805 = vrot.lane.b32.xlu2 %v1804_v23, %s1968_s8  ;;  %v984_v26 = vsel %vm457_vm3, %v982_v24, %v983_v25 }
 0x1e7   : > { %v853_v30 = vadd.f32 %v2330_v36, %v841_v28  ;;  %v1819_v31 = vpack.i.bf16 %v984_v26, %v981_v45  ;;  %v960_v34 = vsel %vm432_vm2, %v958_v27, %v959_v29  ;;  %v1829_v52 = vpack.i.bf16 %v987_v51, %v984_v26 }
 0x1e8   : > { %v1814_v33 = vpack.i.bf16 %v960_v34, %v957_v18  ;;  %v1824_v50 = vpack.i.bf16 %v963_v43, %v960_v34  ;;  %v996_v45 = vsel %vm457_vm3, %v994_v61, %v995_v17  ;;  %v970_v18 = vrot.slane %v2415_v16, 1 }
 0x1e9   : > { %vm861_vm8 = vcmp.ge.f32.partialorder %v853_v30, 0.0  ;;  %v869_v38 = vmul.f32 0.01, %v853_v30  ;;  %1820 = vrot.lane.b32.xlu1 %v1819_v31, %s1976_s28  ;;  %v1894_v23 = vpack.i.bf16 %v996_v45, %v993_v10 }
 0x1ea   : > { %1815 = vrot.lane.b32.xlu0 %v1814_v33, %s1975_s15  ;;  %v972_v24 = vsel %vm432_vm2, %v970_v18, %v971_v55 }
 0x1eb   : > { %v877_v0 = vsel %vm861_vm8, %v853_v30, %v869_v38  ;;  %v1889_v28 = vpack.i.bf16 %v972_v24, %v969_v14 }
 0x1ec   : > { %913 = vst.msk [vmem:[#allocation3 + $0x71] sm:$0xff] %vm698_vm4, %v877_v0  ;;  %v828_v44 = vpop.f32.mrf.mxu3 }
 0x1ed   : > { %v842_v48 = vmul.f32 %v2325_v15, %v828_v44  ;;  %v2391_v15 = vld [vmem:[#allocation3 + $0x40] sm:$0xff] }
 0x1ee   : > { %1810 = vrot.lane.b32.xlu2 %v1809_v47, %s1977_s29  ;;  %v1844_v60 = vpack.i.bf16 %v2391_v15, %v2375_v35  ;;  %v964_v62 = vrot.slane %v2391_v15, 1  ;;  %v1859_v9 = vpack.i.bf16 %v2402_v4, %v2391_v15 }
 0x1ef   : > { %v854_v49 = vadd.f32 %v2330_v36, %v842_v48  ;;  %v988_v36 = vrot.slane %v2391_v15, 2 }
 0x1f0   : > { %v966_v3 = vsel %vm432_vm2, %v964_v62, %v965_v1 }
 0x1f1   : > { %vm862_vm10 = vcmp.ge.f32.partialorder %v854_v49, 0.0  ;;  %v870_v53 = vmul.f32 0.01, %v854_v49  ;;  %1825 = vrot.lane.b32.xlu1 %v1824_v50, %s1978_s30  ;;  %v990_v2 = vsel %vm457_vm3, %v988_v36, %v989_v59  ;;  %v1849_v8 = vpack.i.bf16 %v966_v3, %v963_v43  ;;  %v934_v43 = vld [vmem:[#allocation3 + $0x90] sm:$0xff] }
 0x1f2   : > { %1830 = vrot.lane.b32.xlu0 %v1829_v52, %s1979_s9  ;;  %v1854_v5 = vpack.i.bf16 %v990_v2, %v987_v51  ;;  %v1869_v13 = vpack.i.bf16 %v993_v10, %v990_v2  ;;  %v1864_v41 = vpack.i.bf16 %v969_v14, %v966_v3  ;;  %v1010_v56 = vrot.slane %v934_v43, 1  ;;  %v1288_v2 = vld [vmem:[%s2562_s4 + $0x20] sm:$0xf] }
 0x1f3   : > { %v878_v57 = vsel %vm862_vm10, %v854_v49, %v870_v53  ;;  %v2423_v20 = vld [vmem:[#allocation3 + $0x70] sm:$0xff]  ;;  %v931_v58 = vld [vmem:[#allocation3 + $0x78] sm:$0x3]  ;;  %v1306_v63 = vunpack.c.l.b16 %v1288_v2  ;;  %v1541_v10 = vld [vmem:[%s2562_s4] sm:$0xff] }
 0x1f4   : > { %915 = vst.msk [vmem:[#allocation3 + $0x81] sm:$0xff] %vm698_vm4, %v878_v57  ;;  %v997_v25 = vrot.slane %v2423_v20, 2  ;;  %v998_v27 = vrot.slane %v931_v58, 2  ;;  %v973_v26 = vrot.slane %v2423_v20, 1  ;;  %v974_v30 = vrot.slane %v931_v58, 1 }
 0x1f5   : > { %v1899_v31 = vpack.i.bf16 %v2423_v20, %v2415_v16  ;;  %v935_v49 = vld [vmem:[#allocation3 + $0x98] sm:$0x3] }
 0x1f6   : > { %1840 = vrot.lane.b32.xlu2 %v1829_v52, %s1970_s10  ;;  %v999_v29 = vsel %vm457_vm3, %v997_v25, %v998_v27  ;;  %v975_v37 = vsel %vm432_vm2, %v973_v26, %v974_v30  ;;  %v1013_v52 = vrot.slane %v934_v43, 2  ;;  %v1014_v53 = vrot.slane %v935_v49, 2 }
 0x1f7   : > { %v1909_v34 = vpack.i.bf16 %v999_v29, %v996_v45  ;;  %v1904_v33 = vpack.i.bf16 %v975_v37, %v972_v24  ;;  %v1011_v57 = vrot.slane %v935_v49, 1 }
 0x1f8   : > { %v1015_v59 = vsel %vm457_vm3, %v1013_v52, %v1014_v53 }
 0x1f9   : > { %1835 = vrot.lane.b32.xlu1 %v1824_v50, %s1973_s13 }
 0x1fa   : > { %1845 = vrot.lane.b32.xlu0 %v1844_v60, %s1968_s8  ;;  %v1012_v60 = vsel %vm432_vm2, %v1010_v56, %v1011_v57 }
 0x1fb   : > { %v932_v38 = vld [vmem:[#allocation3 + $0x80] sm:$0xff]  ;;  %v933_v39 = vld [vmem:[#allocation3 + $0x88] sm:$0x3] }
 0x1fc   : > { %v1005_v19 = vrot.slane %v932_v38, 2  ;;  %v1006_v0 = vrot.slane %v933_v39, 2  ;;  %v1002_v40 = vrot.slane %v932_v38, 1  ;;  %v1003_v42 = vrot.slane %v933_v39, 1 }
 0x1fd   : > { %v1924_v44 = vpack.i.bf16 %v932_v38, %v2423_v20  ;;  %v1929_v36 = vpack.i.bf16 %v934_v43, %v932_v38 }
 0x1fe   : > { %1855 = vrot.lane.b32.xlu2 %v1854_v5, %s1976_s28  ;;  %v1007_v47 = vsel %vm457_vm3, %v1005_v19, %v1006_v0  ;;  %v1004_v48 = vsel %vm432_vm2, %v1002_v40, %v1003_v42  ;;  %v1311_v5 = vpack.c.b16 %v1306_v63, %v1306_v63  ;;  %vm1240_vm2 = vcmask 326656  }
 0x1ff   : > { %v1939_v50 = vpack.i.bf16 %v1007_v47, %v999_v29  ;;  %v1934_v51 = vpack.i.bf16 %v1004_v48, %v975_v37  ;;  %v1949_v62 = vpack.i.bf16 %v1015_v59, %v1007_v47  ;;  %v1944_v1 = vpack.i.bf16 %v1012_v60, %v1004_v48 }
 0x200   : > { %v1331_v3 = vsel %vm1329_vm12, %v1311_v5, 0  ;;  %vm1249_vm3 = vcmask 392192  }
 0x201   : > { %1850 = vrot.lane.b32.xlu1 %v1849_v8, %s1975_s15  ;;  %1336 = vmatpush.bf16.msra.mxu1 %v1331_v3 }
 0x202   : > { %1860 = vrot.lane.b32.xlu0 %v1859_v9, %s1977_s29  ;;  %1587 = vmatpush.bf16.msra.mxu2 %v1331_v3  ;;  %v1542_v9 = vld [vmem:[%s2562_s4 + $0x8] sm:$0xff] }
 0x205   : > { %1337 = vmatpush.bf16.msra.mxu1 %v1544_v6 }
 0x206   : > { %1870 = vrot.lane.b32.xlu2 %v1869_v13, %s1970_s10  ;;  %1588 = vmatpush.bf16.msra.mxu2 %v1544_v6 }
 0x209   : > { %1880 = vrot.lane.b32.xlu1 %v1869_v13, %s1979_s9  ;;  %1338 = vmatpush.bf16.msra.mxu1 %v1543_v7 }
 0x20a   : > { %1865 = vrot.lane.b32.xlu0 %v1864_v41, %s1973_s13  ;;  %1589 = vmatpush.bf16.msra.mxu2 %v1543_v7 }
 0x20d   : > { %1339 = vmatpush.bf16.msra.mxu1 %v1542_v9 }
 0x20e   : > { %1875 = vrot.lane.b32.xlu2 %v1864_v41, %s1978_s30  ;;  %1590 = vmatpush.bf16.msra.mxu2 %v1542_v9 }
 0x211   : > { %1885 = vrot.lane.b32.xlu1 %v1884_v22, %s1968_s8  ;;  %1340 = vmatpush.bf16.msra.mxu1 %v1541_v10 }
 0x212   : > { %1895 = vrot.lane.b32.xlu0 %v1894_v23, %s1976_s28  ;;  %1591 = vmatpush.bf16.msra.mxu2 %v1541_v10 }
 0x216   : > { %1890 = vrot.lane.b32.xlu2 %v1889_v28, %s1975_s15 }
 0x219   : > { %1900 = vrot.lane.b32.xlu1 %v1899_v31, %s1977_s29 }
 0x21a   : > { %1910 = vrot.lane.b32.xlu0 %v1909_v34, %s1979_s9 }
 0x21e   : > { %1905 = vrot.lane.b32.xlu2 %v1904_v33, %s1978_s30 }
 0x221   : > { %1915 = vrot.lane.b32.xlu1 %v1904_v33, %s1973_s13 }
 0x222   : > { %1920 = vrot.lane.b32.xlu0 %v1909_v34, %s1970_s10 }
 0x226   : > { %1925 = vrot.lane.b32.xlu2 %v1924_v44, %s1968_s8 }
 0x229   : > { %1940 = vrot.lane.b32.xlu1 %v1939_v50, %s1976_s28  ;;  %s276_s28 = scalar_lea.vmem %s2565_s7, %s1503_s23 }
 0x22a   : > { %1935 = vrot.lane.b32.xlu0 %v1934_v51, %s1975_s15 }
 0x22e   : > { %1930 = vrot.lane.b32.xlu2 %v1929_v36, %s1977_s29 }
 0x231   : > { %1950 = vrot.lane.b32.xlu1 %v1949_v62, %s1979_s9 }
 0x232   : > { %1945 = vrot.lane.b32.xlu0 %v1944_v1, %s1978_s30 }
 0x240   : > { %v1806_v8 = vpop.permute.xlu2 %1805 }
 0x241   : > { %v1808_v23 = vunpack.i.h.bf16 %v1806_v8  ;;  %v1807_v24 = vunpack.i.l.bf16 %v1806_v8 }
 0x248   : > { %v1811_v46 = vpop.permute.xlu2 %1810 }
 0x249   : > { %v1813_v38 = vunpack.i.h.bf16 %v1811_v46  ;;  %v1812_v39 = vunpack.i.l.bf16 %v1811_v46 }
 0x250   : > { %v1841_v41 = vpop.permute.xlu2 %1840 }
 0x251   : > { %v1843_v2 = vunpack.i.h.bf16 %v1841_v41  ;;  %v1842_v63 = vunpack.i.l.bf16 %v1841_v41 }
 0x253   : > { %v1801_v11 = vpop.permute.xlu1 %1800  ;;  %v1796_v13 = vpop.permute.xlu0 %1795 }
 0x254   : > { %v1798_v14 = vunpack.i.h.bf16 %v1796_v13  ;;  %v1797_v32 = vunpack.i.l.bf16 %v1796_v13  ;;  %v1803_v61 = vunpack.i.h.bf16 %v1801_v11  ;;  %v1802_v17 = vunpack.i.l.bf16 %v1801_v11 }
 0x256   : > { %v1209_v45 = vsel %vm698_vm4, %v2353_v12, %v1798_v14  ;;  %v1208_v18 = vsel %vm698_vm4, %v2345_v54, %v1797_v32 }
 0x257   : > { %v1217_v55 = vsel %vm716_vm7, %v1209_v45, %v1803_v61  ;;  %v1216_v58 = vsel %vm716_vm7, %v1208_v18, %v1802_v17 }
 0x258   : > { %v1224_v30 = vsel %vm734_vm9, %v1216_v58, %v1807_v24  ;;  %v1225_v31 = vsel %vm734_vm9, %v1217_v55, %v1808_v23  ;;  %v1856_v34 = vpop.permute.xlu2 %1855 }
 0x259   : > { %v1858_v13 = vunpack.i.h.bf16 %v1856_v34  ;;  %v1857_v14 = vunpack.i.l.bf16 %v1856_v34 }
 0x25b   : > { %v1821_v22 = vpop.permute.xlu1 %1820 }
 0x25c   : > { %v1816_v25 = vpop.permute.xlu0 %1815  ;;  %v1823_v29 = vunpack.i.h.bf16 %v1821_v22  ;;  %v1822_v26 = vunpack.i.l.bf16 %v1821_v22 }
 0x25d   : > { %v1818_v27 = vunpack.i.h.bf16 %v1816_v25  ;;  %v1817_v28 = vunpack.i.l.bf16 %v1816_v25 }
 0x25f   : > { %v1233_v12 = vsel %vm752_vm11, %v1225_v31, %v1818_v27  ;;  %v1232_v54 = vsel %vm752_vm11, %v1224_v30, %v1817_v28 }
 0x260   : > { %v1242_v37 = vsel %vm1240_vm2, %v1233_v12, %v1823_v29  ;;  %v1241_v33 = vsel %vm1240_vm2, %v1232_v54, %v1822_v26  ;;  %v1871_v56 = vpop.permute.xlu2 %1870 }
 0x261   : > { %v1250_v44 = vsel %vm1249_vm3, %v1241_v33, %v1812_v39  ;;  %v1251_v47 = vsel %vm1249_vm3, %v1242_v37, %v1813_v38 }
 0x263   : > { %v1826_v19 = vpop.permute.xlu1 %1825 }
 0x264   : > { %v1828_v0 = vunpack.i.h.bf16 %v1826_v19  ;;  %v1827_v40 = vunpack.i.l.bf16 %v1826_v19  ;;  %v1831_v42 = vpop.permute.xlu0 %1830  ;;  %v1873_v19 = vunpack.i.h.bf16 %v1871_v56 }
 0x265   : > { %v1833_v48 = vunpack.i.h.bf16 %v1831_v42  ;;  %v1832_v43 = vunpack.i.l.bf16 %v1831_v42 }
 0x266   : > { %v1259_v49 = vsel %vm1258_vm13, %v1250_v44, %v1827_v40  ;;  %v1260_v50 = vsel %vm1258_vm13, %v1251_v47, %v1828_v0  ;;  %v1872_v0 = vunpack.i.l.bf16 %v1871_v56 }
 0x267   : > { %v1268_v51 = vsel %vm1267_vm14, %v1259_v49, %v1832_v43  ;;  %v1269_v52 = vsel %vm1267_vm14, %v1260_v50, %v1833_v48 }
 0x268   : > { %v1276_v53 = vpack.c.bf16 %v1269_v52, %v1268_v51  ;;  %v1876_v9 = vpop.permute.xlu2 %1875 }
 0x269   : > { %v1878_v22 = vunpack.i.h.bf16 %v1876_v9  ;;  %v1877_v23 = vunpack.i.l.bf16 %v1876_v9 }
 0x26a   : > { %1532 = vmatmul.msk.bf16.vlgmr.msra.gmra.mxu1 %vm1316_vm15, %v1276_v53 }
 0x26b   : > { %v1836_v57 = vpop.permute.xlu1 %1835 }
 0x26c   : > { %v1838_v36 = vunpack.i.h.bf16 %v1836_v57  ;;  %v1837_v59 = vunpack.i.l.bf16 %v1836_v57  ;;  %v1846_v60 = vpop.permute.xlu0 %1845 }
 0x26d   : > { %v1848_v6 = vunpack.i.h.bf16 %v1846_v60  ;;  %v1847_v7 = vunpack.i.l.bf16 %v1846_v60 }
 0x26e   : > { %v1211_v62 = vsel %vm698_vm4, %v2375_v35, %v1838_v36  ;;  %v1210_v1 = vsel %vm698_vm4, %v2364_v21, %v1837_v59 }
 0x26f   : > { %v1218_v5 = vsel %vm716_vm7, %v1210_v1, %v1842_v63  ;;  %v1219_v3 = vsel %vm716_vm7, %v1211_v62, %v1843_v2 }
 0x270   : > { %v1227_v35 = vsel %vm734_vm9, %v1219_v3, %v1848_v6  ;;  %v1226_v32 = vsel %vm734_vm9, %v1218_v5, %v1847_v7  ;;  %v1891_v30 = vpop.permute.xlu2 %1890 }
 0x271   : > { %v1893_v50 = vunpack.i.h.bf16 %v1891_v30  ;;  %v1892_v51 = vunpack.i.l.bf16 %v1891_v30 }
 0x273   : > { %v1851_v8 = vpop.permute.xlu1 %1850 }
 0x274   : > { %v1853_v10 = vunpack.i.h.bf16 %v1851_v8  ;;  %v1852_v46 = vunpack.i.l.bf16 %v1851_v8  ;;  %v1861_v11 = vpop.permute.xlu0 %1860 }
 0x275   : > { %v1863_v45 = vunpack.i.h.bf16 %v1861_v11  ;;  %v1862_v18 = vunpack.i.l.bf16 %v1861_v11 }
 0x276   : > { %v1234_v21 = vsel %vm752_vm11, %v1226_v32, %v1852_v46  ;;  %v1235_v41 = vsel %vm752_vm11, %v1227_v35, %v1853_v10 }
 0x277   : > { %v1243_v61 = vsel %vm1240_vm2, %v1234_v21, %v1857_v14  ;;  %v1244_v17 = vsel %vm1240_vm2, %v1235_v41, %v1858_v13 }
 0x278   : > { %v1253_v55 = vsel %vm1249_vm3, %v1244_v17, %v1863_v45  ;;  %v1252_v58 = vsel %vm1249_vm3, %v1243_v61, %v1862_v18 }
 0x279   : > { %v1261_v29 = vsel %vm1258_vm13, %v1252_v58, %v1877_v23  ;;  %v1262_v26 = vsel %vm1258_vm13, %v1253_v55, %v1878_v22 }
 0x27b   : > { %v1881_v24 = vpop.permute.xlu1 %1880 }
 0x27c   : > { %v1883_v25 = vunpack.i.h.bf16 %v1881_v24  ;;  %v1882_v27 = vunpack.i.l.bf16 %v1881_v24  ;;  %v1866_v28 = vpop.permute.xlu0 %1865 }
 0x27d   : > { %v1868_v54 = vunpack.i.h.bf16 %v1866_v28  ;;  %v1867_v34 = vunpack.i.l.bf16 %v1866_v28 }
 0x27e   : > { %v1270_v31 = vsel %vm1267_vm14, %v1261_v29, %v1882_v27  ;;  %v1271_v12 = vsel %vm1267_vm14, %v1262_v26, %v1883_v25 }
 0x27f   : > { %v1277_v37 = vpack.c.bf16 %v1271_v12, %v1270_v31  ;;  %v1213_v33 = vsel %vm698_vm4, %v2402_v4, %v1868_v54  ;;  %v1212_v38 = vsel %vm698_vm4, %v2391_v15, %v1867_v34  ;;  %v1906_v4 = vpop.permute.xlu2 %1905 }
 0x280   : > { %v1220_v47 = vsel %vm716_vm7, %v1212_v38, %v1872_v0  ;;  %v1221_v48 = vsel %vm716_vm7, %v1213_v33, %v1873_v19  ;;  %v1908_v62 = vunpack.i.h.bf16 %v1906_v4  ;;  %v1907_v1 = vunpack.i.l.bf16 %v1906_v4  ;;  %v1957_v4 = vld [vmem:[%s2564_s6] ss:$0 sm:$0xff] }
 0x281   : > { %1533 = vmatmul.msk.bf16.gmra.mxu1 %vm1316_vm15, %v1277_v37 }
 0x283   : > { %v1886_v39 = vpop.permute.xlu1 %1885 }
 0x284   : > { %v1888_v40 = vunpack.i.h.bf16 %v1886_v39  ;;  %v1887_v42 = vunpack.i.l.bf16 %v1886_v39  ;;  %v1896_v44 = vpop.permute.xlu0 %1895 }
 0x285   : > { %v1898_v53 = vunpack.i.h.bf16 %v1896_v44  ;;  %v1897_v56 = vunpack.i.l.bf16 %v1896_v44 }
 0x286   : > { %v1229_v43 = vsel %vm734_vm9, %v1221_v48, %v1888_v40  ;;  %v1228_v49 = vsel %vm734_vm9, %v1220_v47, %v1887_v42 }
 0x287   : > { %v1236_v52 = vsel %vm752_vm11, %v1228_v49, %v1892_v51  ;;  %v1237_v15 = vsel %vm752_vm11, %v1229_v43, %v1893_v50  ;;  %v1926_v13 = vpop.permute.xlu2 %1925  ;;  %v1956_v51 = vld [vmem:[%s2563_s5] ss:$0 sm:$0xff] }
 0x288   : > { %v1245_v2 = vsel %vm1240_vm2, %v1236_v52, %v1897_v56  ;;  %v1246_v63 = vsel %vm1240_vm2, %v1237_v15, %v1898_v53  ;;  %v1928_v22 = vunpack.i.h.bf16 %v1926_v13  ;;  %v1927_v23 = vunpack.i.l.bf16 %v1926_v13 }
 0x28b   : > { %v1901_v57 = vpop.permute.xlu1 %1900 }
 0x28c   : > { %v1903_v36 = vunpack.i.h.bf16 %v1901_v57  ;;  %v1902_v59 = vunpack.i.l.bf16 %v1901_v57  ;;  %v1911_v60 = vpop.permute.xlu0 %1910 }
 0x28d   : > { %v1913_v6 = vunpack.i.h.bf16 %v1911_v60  ;;  %v1912_v7 = vunpack.i.l.bf16 %v1911_v60 }
 0x28e   : > { %v1255_v5 = vsel %vm1249_vm3, %v1246_v63, %v1903_v36  ;;  %v1254_v3 = vsel %vm1249_vm3, %v1245_v2, %v1902_v59 }
 0x28f   : > { %v1263_v8 = vsel %vm1258_vm13, %v1254_v3, %v1907_v1  ;;  %v1264_v9 = vsel %vm1258_vm13, %v1255_v5, %v1908_v62  ;;  %v1931_v24 = vpop.permute.xlu2 %1930 }
 0x290   : > { %v1272_v10 = vsel %vm1267_vm14, %v1263_v8, %v1912_v7  ;;  %v1273_v46 = vsel %vm1267_vm14, %v1264_v9, %v1913_v6  ;;  %v1933_v31 = vunpack.i.h.bf16 %v1931_v24  ;;  %v1932_v12 = vunpack.i.l.bf16 %v1931_v24 }
 0x291   : > { %v1278_v11 = vpack.c.bf16 %v1273_v46, %v1272_v10 }
 0x293   : > { %v1916_v14 = vpop.permute.xlu1 %1915  ;;  %1534 = vmatmul.msk.bf16.vlgmr.msra.gmra.mxu2 %vm1316_vm15, %v1278_v11 }
 0x294   : > { %v1921_v35 = vpop.permute.xlu0 %1920  ;;  %v1918_v32 = vunpack.i.h.bf16 %v1916_v14  ;;  %v1917_v21 = vunpack.i.l.bf16 %v1916_v14 }
 0x295   : > { %v1923_v41 = vunpack.i.h.bf16 %v1921_v35  ;;  %v1922_v61 = vunpack.i.l.bf16 %v1921_v35 }
 0x296   : > { %v1215_v17 = vsel %vm698_vm4, %v2423_v20, %v1918_v32  ;;  %v1214_v45 = vsel %vm698_vm4, %v2415_v16, %v1917_v21 }
 0x297   : > { %v1223_v18 = vsel %vm716_vm7, %v1215_v17, %v1923_v41  ;;  %v1222_v55 = vsel %vm716_vm7, %v1214_v45, %v1922_v61 }
 0x298   : > { %v1230_v30 = vsel %vm734_vm9, %v1222_v55, %v1927_v23  ;;  %v1231_v20 = vsel %vm734_vm9, %v1223_v18, %v1928_v22 }
 0x29b   : > { %v1941_v58 = vpop.permute.xlu1 %1940 }
 0x29c   : > { %v1943_v25 = vunpack.i.h.bf16 %v1941_v58  ;;  %v1942_v27 = vunpack.i.l.bf16 %v1941_v58  ;;  %v1936_v28 = vpop.permute.xlu0 %1935 }
 0x29d   : > { %v1938_v29 = vunpack.i.h.bf16 %v1936_v28  ;;  %v1937_v26 = vunpack.i.l.bf16 %v1936_v28 }
 0x29f   : > { %v1239_v16 = vsel %vm752_vm11, %v1231_v20, %v1938_v29  ;;  %v1238_v54 = vsel %vm752_vm11, %v1230_v30, %v1937_v26 }
 0x2a0   : > { %v1248_v34 = vsel %vm1240_vm2, %v1239_v16, %v1943_v25  ;;  %v1247_v37 = vsel %vm1240_vm2, %v1238_v54, %v1942_v27 }
 0x2a1   : > { %v1256_v33 = vsel %vm1249_vm3, %v1247_v37, %v1932_v12  ;;  %v1257_v38 = vsel %vm1249_vm3, %v1248_v34, %v1933_v31 }
 0x2a3   : > { %v1951_v39 = vpop.permute.xlu1 %1950 }
 0x2a4   : > { %v1953_v19 = vunpack.i.h.bf16 %v1951_v39  ;;  %v1952_v0 = vunpack.i.l.bf16 %v1951_v39  ;;  %v1946_v40 = vpop.permute.xlu0 %1945 }
 0x2a5   : > { %v1948_v42 = vunpack.i.h.bf16 %v1946_v40  ;;  %v1947_v44 = vunpack.i.l.bf16 %v1946_v40 }
 0x2a7   : > { %v1265_v47 = vsel %vm1258_vm13, %v1256_v33, %v1947_v44  ;;  %v1266_v48 = vsel %vm1258_vm13, %v1257_v38, %v1948_v42 }
 0x2a8   : > { %v1274_v43 = vsel %vm1267_vm14, %v1265_v47, %v1952_v0  ;;  %v1275_v49 = vsel %vm1267_vm14, %v1266_v48, %v1953_v19 }
 0x2a9   : > { %v1279_v50 = vpack.c.bf16 %v1275_v49, %v1274_v43 }
 0x2ab   : > { %1535 = vmatmul.msk.bf16.gmra.mxu2 %vm1316_vm15, %v1279_v50 }
 0x2e7   : > { %v1342_v52 = vpop.f32.mrf.mxu1 }
 0x2e8   : > { %v1366_v15 = vmul.f32 %v1956_v51, %v1342_v52 }
 0x2ea   : > { %v1378_v53 = vadd.f32 %v1957_v4, %v1366_v15 }
 0x2ec   : > { %vm1386_vm4 = vcmp.ge.f32.partialorder %v1378_v53, 0.0  ;;  %v1394_v56 = vmul.f32 0.01, %v1378_v53 }
 0x2ee   : > { %v1402_v57 = vsel %vm1386_vm4, %v1378_v53, %v1394_v56 }
 0x2ef   : > { %v1344_v36 = vpop.f32.mrf.mxu1  ;;  %1410 = vxpose.xlu2.b32.start [1/8] (short) (narrow) %v1402_v57, 8 }
 0x2f0   : > { %v1367_v59 = vmul.f32 %v1956_v51, %v1344_v36 }
 0x2f2   : > { %v1379_v60 = vadd.f32 %v1957_v4, %v1367_v59 }
 0x2f4   : > { %vm1387_vm7 = vcmp.ge.f32.partialorder %v1379_v60, 0.0  ;;  %v1395_v62 = vmul.f32 0.01, %v1379_v60 }
 0x2f6   : > { %v1403_v1 = vsel %vm1387_vm7, %v1379_v60, %v1395_v62 }
 0x2f7   : > { %1411 = vxpose.xlu2.b32.cont [2/8] (short) (narrow) %v1403_v1, 8 }
 0x2fe   : > { %v1347_v2 = vpop.f32.mrf.mxu1 }
 0x2ff   : > { %v1368_v63 = vmul.f32 %v1956_v51, %v1347_v2 }
 0x301   : > { %v1380_v5 = vadd.f32 %v1957_v4, %v1368_v63 }
 0x303   : > { %vm1388_vm9 = vcmp.ge.f32.partialorder %v1380_v5, 0.0  ;;  %v1396_v3 = vmul.f32 0.01, %v1380_v5 }
 0x305   : > { %v1404_v6 = vsel %vm1388_vm9, %v1380_v5, %v1396_v3 }
 0x306   : > { %v1349_v7 = vpop.f32.mrf.mxu1  ;;  %1412 = vxpose.xlu2.b32.cont [3/8] (short) (narrow) %v1404_v6, 8 }
 0x307   : > { %v1369_v8 = vmul.f32 %v1956_v51, %v1349_v7 }
 0x309   : > { %v1381_v9 = vadd.f32 %v1957_v4, %v1369_v8 }
 0x30b   : > { %vm1389_vm11 = vcmp.ge.f32.partialorder %v1381_v9, 0.0  ;;  %v1397_v10 = vmul.f32 0.01, %v1381_v9 }
 0x30d   : > { %v1405_v46 = vsel %vm1389_vm11, %v1381_v9, %v1397_v10 }
 0x30e   : > { %1413 = vxpose.xlu2.b32.cont [4/8] (short) (narrow) %v1405_v46, 8 }
 0x316   : > { %v1352_v11 = vpop.f32.mrf.mxu2 }
 0x317   : > { %v1370_v13 = vmul.f32 %v1956_v51, %v1352_v11 }
 0x319   : > { %v1382_v14 = vadd.f32 %v1957_v4, %v1370_v13 }
 0x31b   : > { %vm1390_vm0 = vcmp.ge.f32.partialorder %v1382_v14, 0.0  ;;  %v1398_v35 = vmul.f32 0.01, %v1382_v14 }
 0x31d   : > { %v1406_v32 = vsel %vm1390_vm0, %v1382_v14, %v1398_v35 }
 0x31e   : > { %v1354_v21 = vpop.f32.mrf.mxu2  ;;  %1414 = vxpose.xlu2.b32.cont [5/8] (short) (narrow) %v1406_v32, 8 }
 0x31f   : > { %v1371_v41 = vmul.f32 %v1956_v51, %v1354_v21 }
 0x321   : > { %v1383_v61 = vadd.f32 %v1957_v4, %v1371_v41 }
 0x323   : > { %vm1391_vm1 = vcmp.ge.f32.partialorder %v1383_v61, 0.0  ;;  %v1399_v17 = vmul.f32 0.01, %v1383_v61 }
 0x325   : > { %v1407_v45 = vsel %vm1391_vm1, %v1383_v61, %v1399_v17 }
 0x326   : > { %1415 = vxpose.xlu2.b32.cont [6/8] (short) (narrow) %v1407_v45, 8 }
 0x32e   : > { %v1357_v18 = vpop.f32.mrf.mxu2 }
 0x32f   : > { %v1372_v55 = vmul.f32 %v1956_v51, %v1357_v18 }
 0x331   : > { %v1384_v58 = vadd.f32 %v1957_v4, %v1372_v55 }
 0x333   : > { %vm1392_vm5 = vcmp.ge.f32.partialorder %v1384_v58, 0.0  ;;  %v1400_v22 = vmul.f32 0.01, %v1384_v58 }
 0x335   : > { %v1408_v23 = vsel %vm1392_vm5, %v1384_v58, %v1400_v22 }
 0x336   : > { %1416 = vxpose.xlu2.b32.cont [7/8] (short) (narrow) %v1408_v23, 8  ;;  %v1359_v24 = vpop.f32.mrf.mxu2 }
 0x337   : > { %v1373_v25 = vmul.f32 %v1956_v51, %v1359_v24 }
 0x339   : > { %v1385_v27 = vadd.f32 %v1957_v4, %v1373_v25 }
 0x33b   : > { %vm1393_vm6 = vcmp.ge.f32.partialorder %v1385_v27, 0.0  ;;  %v1401_v28 = vmul.f32 0.01, %v1385_v27 }
 0x33d   : > { %v1409_v29 = vsel %vm1393_vm6, %v1385_v27, %v1401_v28 }
 0x33e   : > { %1417 = vxpose.xlu2.b32.end [8/8] (short) (narrow) %v1409_v29, 8 }
 0x39f   : > { %v1426_v26 = vpop.trf.xlu2 }
 0x3a0   : > { %1442 = vst.msk [vmem:[%s276_s28] sm:$0xff] %vm1267_vm14, %v1426_v26 }
 0x3a1 PF: > { %s17_s24 = sadd.s32 1, %s1964_s24  }
 0x3a2   : > { %p14_p4 = scmp.ge.s32.totalorder %s17_s24, 4  }
 0x3a4   :  { %16 = sbr.rel (!%p14_p4) target bundleno = 1 (0x1), region = 94 }

</bundles_post_ra>
